<compile_context>
chip_gen: v5e
topology: v5e:2x2
jax: 0.10.0
libtpu: 0.0.40
codegen_flags: <defaults>
</compile_context>

<pallas_src>
import functools

import jax
import jax.numpy as jnp
from jax import lax
from jax.experimental import pallas as pl
from jax.experimental.pallas import tpu as pltpu


# ---------------------------------------------------------------------------
# Fused forward kernel
# ---------------------------------------------------------------------------
def _generator_kernel(za_ref, wca_ref, w2t_ref, b2_ref, w3t_ref, b3_ref,
                      o_ref, x2_ref, x3t_ref, *, batch):
    """Row / column orderings (b = batch, p1 = i1*4+j1 pixel of the 4x4 map,
    kL = kiL*2+kjL sub-pixel of layer L's 2x2 deconv kernel):

      za  : rows (p1, b)      cols (p1', j)        block-diagonal z (+ bias row)
      h1  : rows (p1, b)      cols (k1, c1)        fused fc+c1 output (ReLU)
      x2  : rows (k1, p1, b)  cols c1 (128)        bf16 scratch
      x3t : rows c2 (64)      cols (k2, k1, p1, b) bf16 scratch
      out : rows k3 (4)       cols (k2, k1, p1, b) lane-dense f32
    """
    bf16 = jnp.bfloat16
    B = batch
    M1 = 16 * B                  # rows of h1  (4x4 pixels x batch)
    M2 = 64 * B                  # rows of x2  (8x8 pixels x batch)

    # ---- fused fc + c1 (weights & bias folded host-side) + ReLU ------------
    h1 = jnp.dot(za_ref[...], wca_ref[...],
                 preferred_element_type=jnp.float32)            # (16B, 512)
    h1 = jnp.maximum(h1, 0.0)
    # pixel expansion over k1: 4 tile-aligned (16B,128) block stores, bf16 cast
    for k1 in range(4):
        x2_ref[k1 * M1:(k1 + 1) * M1, :] = (
            h1[:, k1 * 128:(k1 + 1) * 128].astype(bf16))

    # ---- c2: 4 per-k2 transposed GEMMs (channels on sublanes) + ReLU -------
    x2 = x2_ref[...]                                            # (64B, 128) bf16
    for k2 in range(4):
        h2 = lax.dot_general(
            w2t_ref[k2 * 64:(k2 + 1) * 64, :], x2,
            dimension_numbers=(((1,), (1,)), ((), ())),
            preferred_element_type=jnp.float32)                 # (64, 64B)
        h2 = jnp.maximum(h2 + b2_ref[...], 0.0)
        x3t_ref[:, k2 * M2:(k2 + 1) * M2] = h2.astype(bf16)

    # ---- c3: ConvTranspose2d(64 -> 1) + Sigmoid, lane-dense output ---------
    h3 = jnp.dot(w3t_ref[...], x3t_ref[...],
                 preferred_element_type=jnp.float32)            # (4, 256B)
    o_ref[...] = jax.nn.sigmoid(h3 + b3_ref[...]).astype(o_ref.dtype)


def _fused_forward_pallas(za, p, batch):
    """za: [16B, 16*n_pad] bf16 block-diagonal input.  Returns (4, 256*B) f32."""
    B = batch
    out_cols = 256 * B
    n_aug = za.shape[1]

    flops = 2 * (16 * B * n_aug * 512
                 + 4 * 64 * 128 * (64 * B)
                 + 4 * 64 * out_cols)
    bytes_accessed = int(
        za.size * za.dtype.itemsize + 4 * out_cols * 4
        + sum(p[k].size * p[k].dtype.itemsize
              for k in ("wca", "w2t", "b2", "w3t", "b3")))
    cost = pl.CostEstimate(flops=int(flops), transcendentals=4 * out_cols,
                           bytes_accessed=bytes_accessed)

    kernel = functools.partial(_generator_kernel, batch=B)
    return pl.pallas_call(
        kernel,
        out_shape=jax.ShapeDtypeStruct((4, out_cols), jnp.float32),
        grid=(1,),
        in_specs=[
            pl.BlockSpec((16 * B, n_aug), lambda i: (0, 0)),   # za
            pl.BlockSpec((n_aug, 512), lambda i: (0, 0)),      # wca (fc+c1 fold)
            pl.BlockSpec((256, 128), lambda i: (0, 0)),        # w2t
            pl.BlockSpec((64, 1), lambda i: (0, 0)),           # b2
            pl.BlockSpec((4, 64), lambda i: (0, 0)),           # w3t
            pl.BlockSpec((1, 1), lambda i: (0, 0)),            # b3
        ],
        out_specs=pl.BlockSpec((4, out_cols), lambda i: (0, 0)),
        scratch_shapes=[
            pltpu.VMEM((64 * B, 128), jnp.bfloat16),           # x2
            pltpu.VMEM((64, out_cols), jnp.bfloat16),          # x3t
        ],
        compiler_params=pltpu.CompilerParams(
            dimension_semantics=("arbitrary",)),
        cost_estimate=cost,
    )(za, p["wca"], p["w2t"], p["b2"], p["w3t"], p["b3"])


# ---------------------------------------------------------------------------
# Generator forward (wrapper): one-hot concat, block-diag z, kernel, unscramble
# ---------------------------------------------------------------------------
def idx2onehot(idx, n=10):
    return jax.nn.one_hot(idx, n, dtype=jnp.float32)


def generator_forward(prep, z, c=None, conditional=False):
    if conditional:
        z = jnp.concatenate([z, idx2onehot(c, n=10).astype(z.dtype)], axis=-1)
    B, n_in = z.shape
    n_pad = prep["wca"].shape[0] // 16

    # Block-diagonal augmented input: za[(p1,b),(p1',j)] = (p1==p1') * [z|1|0][b,j].
    # ~40 KiB bf16; lets the fused fc+c1 GEMM emit pixels directly on sublanes,
    # so the kernel needs no lane->sublane reshapes / masked sub-tile stores.
    cols = [z, jnp.ones((B, 1), z.dtype)]
    if n_pad > n_in + 1:
        cols.append(jnp.zeros((B, n_pad - n_in - 1), z.dtype))
    z1 = jnp.concatenate(cols, axis=-1)                       # (B, n_pad)
    eye = jnp.eye(16, dtype=z.dtype)
    za = jnp.einsum('pq,bj->pbqj', eye, z1).reshape(16 * B, 16 * n_pad)
    za = za.astype(jnp.bfloat16)

    flat = _fused_forward_pallas(za, prep, B)                 # (4, 256*B) f32
    # rows = (ki3, kj3); cols = (ki2, kj2, ki1, kj1, i1, j1, b)
    x = flat.reshape(2, 2, 2, 2, 2, 2, 4, 4, B)
    # -> (b, i1, ki1, ki2, ki3, j1, kj1, kj2, kj3); y = 8*i1 + 4*ki1 + 2*ki2 + ki3
    x = jnp.transpose(x, (8, 6, 4, 2, 0, 7, 5, 3, 1))
    x = x.reshape(B, 1, 32, 32)
    return x[:, :, 2:-2, 2:-2]                                # padding=2 crop


# ---------------------------------------------------------------------------
# Parameters: PyTorch layouts + one-time conversion to kernel (matmul) layouts
# ---------------------------------------------------------------------------
def init_params(key, n_z, conditional=False):
    """Random params in PyTorch layouts (Linear: [out,in]; deconv: [Cin,Cout,kH,kW])."""
    n_in = n_z + 10 if conditional else n_z
    ks = jax.random.split(key, 8)
    s = 0.05
    return {
        "fc_w": s * jax.random.normal(ks[0], (256 * 4 * 4, n_in), jnp.float32),
        "fc_b": s * jax.random.normal(ks[1], (256 * 4 * 4,), jnp.float32),
        "c1_w": s * jax.random.normal(ks[2], (256, 128, 2, 2), jnp.float32),
        "c1_b": s * jax.random.normal(ks[3], (128,), jnp.float32),
        "c2_w": s * jax.random.normal(ks[4], (128, 64, 2, 2), jnp.float32),
        "c2_b": s * jax.random.normal(ks[5], (64,), jnp.float32),
        "c3_w": s * jax.random.normal(ks[6], (64, 1, 2, 2), jnp.float32),
        "c3_b": s * jax.random.normal(ks[7], (1,), jnp.float32),
    }


def prepare_params(p):
    """One-time relayout: fold fc into c1 (exact) and cast weights to bf16."""
    bf = jnp.bfloat16
    fcw, fcb = p["fc_w"], p["fc_b"]                 # (4096, n_in), (4096,)
    n_in = fcw.shape[1]
    n_pad = ((n_in + 1 + 7) // 8) * 8               # 16*n_pad is a 128 multiple

    fcw_cp = fcw.reshape(256, 16, n_in)             # [c, p1, zi]
    fcb_cp = fcb.reshape(256, 16)                   # [c, p1]
    w1_ck = p["c1_w"].reshape(256, 128, 4)          # [c, cout, k1]
    # Exact fold (no nonlinearity between fc and c1):
    wf = jnp.einsum('cpz,cok->pzko', fcw_cp, w1_ck)                 # (16,n_in,4,128)
    bfold = (jnp.einsum('cp,cok->pko', fcb_cp, w1_ck)
             + p["c1_b"][None, None, :])                            # (16,4,128)
    pieces = [wf, bfold[:, None, :, :]]
    if n_pad > n_in + 1:
        pieces.append(jnp.zeros((16, n_pad - n_in - 1, 4, 128), jnp.float32))
    wca = jnp.concatenate(pieces, axis=1).reshape(16 * n_pad, 512)  # rows (p1, j)

    # c2 (transposed GEMM): row = (ki2*2+kj2)*64 + c2, col = c1
    w2t = jnp.transpose(p["c2_w"], (2, 3, 1, 0)).reshape(256, 128)
    b2 = p["c2_b"].reshape(64, 1)
    # c3 (transposed GEMM): row = ki3*2+kj3, col = c2
    w3t = jnp.transpose(p["c3_w"], (1, 2, 3, 0)).reshape(4, 64)
    b3 = p["c3_b"].reshape(1, 1)
    return {
        "wca": wca.astype(bf),
        "w2t": w2t.astype(bf), "b2": b2.astype(jnp.float32),
        "w3t": w3t.astype(bf), "b3": b3.astype(jnp.float32),
    }


# ---------------------------------------------------------------------------
# Pure-JAX f32 reference (mirrors the PyTorch module directly)
# ---------------------------------------------------------------------------
def _reference_forward(params, z, c=None, conditional=False):
    if conditional:
        z = jnp.concatenate([z, idx2onehot(c, n=10).astype(z.dtype)], axis=-1)
    h = z @ params["fc_w"].T + params["fc_b"]
    h = h.reshape(-1, 256, 4, 4)

    def deconv(x, w, b):           # ConvTranspose2d(k=2, s=2), no padding
        y = jnp.einsum("bchw,cokl->bohkwl", x, w)
        y = y + b[None, :, None, None, None, None]
        Bq, Co, H, _, W, _ = y.shape
        return y.reshape(Bq, Co, 2 * H, 2 * W)

    h = jax.nn.relu(deconv(h, params["c1_w"], params["c1_b"]))
    h = jax.nn.relu(deconv(h, params["c2_w"], params["c2_b"]))
    h = jax.nn.sigmoid(deconv(h, params["c3_w"], params["c3_b"]))
    return h[:, :, 2:-2, 2:-2]     # padding=2 of the ConvTranspose2d


# ---------------------------------------------------------------------------
if __name__ == "__main__":
    B, n_z = 2, 32
    conditional = False  # opt.conditional = False for this run
    key = jax.random.PRNGKey(0)
    kp, kz = jax.random.split(key)
    params = init_params(kp, n_z, conditional=conditional)
    z = jax.random.normal(kz, (B, n_z), jnp.float32)

    prep = prepare_params(params)   # one-time weight fold + relayout + bf16 cast
    fwd = jax.jit(functools.partial(generator_forward, conditional=conditional))
    out = jax.block_until_ready(fwd(prep, z))

    assert out.shape == (B, 1, 28, 28), out.shape
    assert bool(jnp.all(jnp.isfinite(out)))
    assert bool(jnp.all((out >= 0.0) & (out <= 1.0)))   # sigmoid range

    ref = _reference_forward(params, z, conditional=conditional)
    max_err = float(jnp.max(jnp.abs(out - ref)))
    assert max_err < 2e-2, f"max abs err vs f32 reference: {max_err}"

    print("KERNEL_OK")
</pallas_src>

<mosaic_0001>
module attributes {stable_mosaic.version = 11 : i64} {
  func.func @_generator_kernel(%arg0: i32, %arg1: memref<32x640xbf16, #tpu.memory_space<vmem>>, %arg2: memref<640x512xbf16, #tpu.memory_space<vmem>>, %arg3: memref<256x128xbf16, #tpu.memory_space<vmem>>, %arg4: memref<64x1xf32, #tpu.memory_space<vmem>>, %arg5: memref<4x64xbf16, #tpu.memory_space<vmem>>, %arg6: memref<1x1xf32, #tpu.memory_space<vmem>>, %arg7: memref<4x512xf32, #tpu.memory_space<vmem>>, %arg8: memref<128x128xbf16, #tpu.memory_space<vmem>>, %arg9: memref<64x512xbf16, #tpu.memory_space<vmem>>) attributes {dimension_semantics = [#tpu.dimension_semantics<arbitrary>], iteration_bounds = array<i64: 1>, scalar_prefetch = 0 : i64, scratch_operands = 2 : i64, tpu.core_type = #tpu.core_type<tc>, window_params = [{pipeline_mode = #tpu.pipeline_mode<synchronous>, transform_indices = @transform_0, window_bounds = array<i64: 32, 640>}, {pipeline_mode = #tpu.pipeline_mode<synchronous>, transform_indices = @transform_1, window_bounds = array<i64: 640, 512>}, {pipeline_mode = #tpu.pipeline_mode<synchronous>, transform_indices = @transform_2, window_bounds = array<i64: 256, 128>}, {pipeline_mode = #tpu.pipeline_mode<synchronous>, transform_indices = @transform_3, window_bounds = array<i64: 64, 1>}, {pipeline_mode = #tpu.pipeline_mode<synchronous>, transform_indices = @transform_4, window_bounds = array<i64: 4, 64>}, {pipeline_mode = #tpu.pipeline_mode<synchronous>, transform_indices = @transform_5, window_bounds = array<i64: 1, 1>}, {pipeline_mode = #tpu.pipeline_mode<synchronous>, transform_indices = @transform_6, window_bounds = array<i64: 4, 512>}]} {
    %c0 = arith.constant 0 : index
    %c0_0 = arith.constant 0 : index
    %0 = vector.load %arg1[%c0, %c0_0] : memref<32x640xbf16, #tpu.memory_space<vmem>>, vector<32x640xbf16>
    %c0_1 = arith.constant 0 : index
    %c0_2 = arith.constant 0 : index
    %1 = vector.load %arg2[%c0_1, %c0_2] : memref<640x512xbf16, #tpu.memory_space<vmem>>, vector<640x512xbf16>
    %cst = arith.constant dense<0.000000e+00> : vector<32x512xf32>
    %2 = tpu.matmul %0, %1, %cst {dimension_numbers = #tpu.dot_dimension_numbers<[1], [0], [0], [1], [0, 0, 1, 1], [], []>} : vector<32x640xbf16>, vector<640x512xbf16>, vector<32x512xf32> -> vector<32x512xf32>
    %cst_3 = arith.constant 0.000000e+00 : f32
    %3 = vector.broadcast %cst_3 : f32 to vector<32x512xf32>
    %4 = arith.maximumf %2, %3 : vector<32x512xf32>
    %5 = vector.extract_strided_slice %4 {offsets = [0, 0], sizes = [32, 128], strides = [1, 1]} : vector<32x512xf32> to vector<32x128xf32>
    %6 = arith.truncf %5 : vector<32x128xf32> to vector<32x128xbf16>
    %c0_4 = arith.constant 0 : index
    %c0_5 = arith.constant 0 : index
    %7 = vector.load %arg8[%c0_4, %c0_5] : memref<128x128xbf16, #tpu.memory_space<vmem>>, vector<32x128xbf16>
    tpu.vector_store %arg8[%c0_4, %c0_5], %6 {strides = array<i32>} : memref<128x128xbf16, #tpu.memory_space<vmem>>, vector<32x128xbf16>,
    %8 = vector.extract_strided_slice %4 {offsets = [0, 128], sizes = [32, 128], strides = [1, 1]} : vector<32x512xf32> to vector<32x128xf32>
    %9 = arith.truncf %8 : vector<32x128xf32> to vector<32x128xbf16>
    %c32 = arith.constant 32 : index
    %c0_6 = arith.constant 0 : index
    %10 = vector.load %arg8[%c32, %c0_6] : memref<128x128xbf16, #tpu.memory_space<vmem>>, vector<32x128xbf16>
    tpu.vector_store %arg8[%c32, %c0_6], %9 {strides = array<i32>} : memref<128x128xbf16, #tpu.memory_space<vmem>>, vector<32x128xbf16>,
    %11 = vector.extract_strided_slice %4 {offsets = [0, 256], sizes = [32, 128], strides = [1, 1]} : vector<32x512xf32> to vector<32x128xf32>
    %12 = arith.truncf %11 : vector<32x128xf32> to vector<32x128xbf16>
    %c64 = arith.constant 64 : index
    %c0_7 = arith.constant 0 : index
    %13 = vector.load %arg8[%c64, %c0_7] : memref<128x128xbf16, #tpu.memory_space<vmem>>, vector<32x128xbf16>
    tpu.vector_store %arg8[%c64, %c0_7], %12 {strides = array<i32>} : memref<128x128xbf16, #tpu.memory_space<vmem>>, vector<32x128xbf16>,
    %14 = vector.extract_strided_slice %4 {offsets = [0, 384], sizes = [32, 128], strides = [1, 1]} : vector<32x512xf32> to vector<32x128xf32>
    %15 = arith.truncf %14 : vector<32x128xf32> to vector<32x128xbf16>
    %c96 = arith.constant 96 : index
    %c0_8 = arith.constant 0 : index
    %16 = vector.load %arg8[%c96, %c0_8] : memref<128x128xbf16, #tpu.memory_space<vmem>>, vector<32x128xbf16>
    tpu.vector_store %arg8[%c96, %c0_8], %15 {strides = array<i32>} : memref<128x128xbf16, #tpu.memory_space<vmem>>, vector<32x128xbf16>,
    %c0_9 = arith.constant 0 : index
    %c0_10 = arith.constant 0 : index
    %17 = vector.load %arg8[%c0_9, %c0_10] : memref<128x128xbf16, #tpu.memory_space<vmem>>, vector<128x128xbf16>
    %c0_11 = arith.constant 0 : index
    %c0_12 = arith.constant 0 : index
    %18 = vector.load %arg3[%c0_11, %c0_12] : memref<256x128xbf16, #tpu.memory_space<vmem>>, vector<64x128xbf16>
    %cst_13 = arith.constant dense<0.000000e+00> : vector<64x128xf32>
    %19 = tpu.matmul %18, %17, %cst_13 {dimension_numbers = #tpu.dot_dimension_numbers<[1], [1], [0], [0], [0, 0, 1, 0], [], []>} : vector<64x128xbf16>, vector<128x128xbf16>, vector<64x128xf32> -> vector<64x128xf32>
    %c0_14 = arith.constant 0 : index
    %c0_15 = arith.constant 0 : index
    %20 = vector.load %arg4[%c0_14, %c0_15] : memref<64x1xf32, #tpu.memory_space<vmem>>, vector<64x1xf32>
    %21 = vector.broadcast %20 : vector<64x1xf32> to vector<64x128xf32>
    %22 = arith.addf %19, %21 : vector<64x128xf32>
    %cst_16 = arith.constant 0.000000e+00 : f32
    %23 = vector.broadcast %cst_16 : f32 to vector<64x128xf32>
    %24 = arith.maximumf %22, %23 : vector<64x128xf32>
    %25 = arith.truncf %24 : vector<64x128xf32> to vector<64x128xbf16>
    %c0_17 = arith.constant 0 : index
    %c0_18 = arith.constant 0 : index
    %26 = vector.load %arg9[%c0_17, %c0_18] : memref<64x512xbf16, #tpu.memory_space<vmem>>, vector<64x128xbf16>
    tpu.vector_store %arg9[%c0_17, %c0_18], %25 {strides = array<i32>} : memref<64x512xbf16, #tpu.memory_space<vmem>>, vector<64x128xbf16>,
    %c64_19 = arith.constant 64 : index
    %c0_20 = arith.constant 0 : index
    %27 = vector.load %arg3[%c64_19, %c0_20] : memref<256x128xbf16, #tpu.memory_space<vmem>>, vector<64x128xbf16>
    %cst_21 = arith.constant dense<0.000000e+00> : vector<64x128xf32>
    %28 = tpu.matmul %27, %17, %cst_21 {dimension_numbers = #tpu.dot_dimension_numbers<[1], [1], [0], [0], [0, 0, 1, 0], [], []>} : vector<64x128xbf16>, vector<128x128xbf16>, vector<64x128xf32> -> vector<64x128xf32>
    %c0_22 = arith.constant 0 : index
    %c0_23 = arith.constant 0 : index
    %29 = vector.load %arg4[%c0_22, %c0_23] : memref<64x1xf32, #tpu.memory_space<vmem>>, vector<64x1xf32>
    %30 = vector.broadcast %29 : vector<64x1xf32> to vector<64x128xf32>
    %31 = arith.addf %28, %30 : vector<64x128xf32>
    %cst_24 = arith.constant 0.000000e+00 : f32
    %32 = vector.broadcast %cst_24 : f32 to vector<64x128xf32>
    %33 = arith.maximumf %31, %32 : vector<64x128xf32>
    %34 = arith.truncf %33 : vector<64x128xf32> to vector<64x128xbf16>
    %c0_25 = arith.constant 0 : index
    %c128 = arith.constant 128 : index
    %35 = vector.load %arg9[%c0_25, %c128] : memref<64x512xbf16, #tpu.memory_space<vmem>>, vector<64x128xbf16>
    tpu.vector_store %arg9[%c0_25, %c128], %34 {strides = array<i32>} : memref<64x512xbf16, #tpu.memory_space<vmem>>, vector<64x128xbf16>,
    %c128_26 = arith.constant 128 : index
    %c0_27 = arith.constant 0 : index
    %36 = vector.load %arg3[%c128_26, %c0_27] : memref<256x128xbf16, #tpu.memory_space<vmem>>, vector<64x128xbf16>
    %cst_28 = arith.constant dense<0.000000e+00> : vector<64x128xf32>
    %37 = tpu.matmul %36, %17, %cst_28 {dimension_numbers = #tpu.dot_dimension_numbers<[1], [1], [0], [0], [0, 0, 1, 0], [], []>} : vector<64x128xbf16>, vector<128x128xbf16>, vector<64x128xf32> -> vector<64x128xf32>
    %c0_29 = arith.constant 0 : index
    %c0_30 = arith.constant 0 : index
    %38 = vector.load %arg4[%c0_29, %c0_30] : memref<64x1xf32, #tpu.memory_space<vmem>>, vector<64x1xf32>
    %39 = vector.broadcast %38 : vector<64x1xf32> to vector<64x128xf32>
    %40 = arith.addf %37, %39 : vector<64x128xf32>
    %cst_31 = arith.constant 0.000000e+00 : f32
    %41 = vector.broadcast %cst_31 : f32 to vector<64x128xf32>
    %42 = arith.maximumf %40, %41 : vector<64x128xf32>
    %43 = arith.truncf %42 : vector<64x128xf32> to vector<64x128xbf16>
    %c0_32 = arith.constant 0 : index
    %c256 = arith.constant 256 : index
    %44 = vector.load %arg9[%c0_32, %c256] : memref<64x512xbf16, #tpu.memory_space<vmem>>, vector<64x128xbf16>
    tpu.vector_store %arg9[%c0_32, %c256], %43 {strides = array<i32>} : memref<64x512xbf16, #tpu.memory_space<vmem>>, vector<64x128xbf16>,
    %c192 = arith.constant 192 : index
    %c0_33 = arith.constant 0 : index
    %45 = vector.load %arg3[%c192, %c0_33] : memref<256x128xbf16, #tpu.memory_space<vmem>>, vector<64x128xbf16>
    %cst_34 = arith.constant dense<0.000000e+00> : vector<64x128xf32>
    %46 = tpu.matmul %45, %17, %cst_34 {dimension_numbers = #tpu.dot_dimension_numbers<[1], [1], [0], [0], [0, 0, 1, 0], [], []>} : vector<64x128xbf16>, vector<128x128xbf16>, vector<64x128xf32> -> vector<64x128xf32>
    %c0_35 = arith.constant 0 : index
    %c0_36 = arith.constant 0 : index
    %47 = vector.load %arg4[%c0_35, %c0_36] : memref<64x1xf32, #tpu.memory_space<vmem>>, vector<64x1xf32>
    %48 = vector.broadcast %47 : vector<64x1xf32> to vector<64x128xf32>
    %49 = arith.addf %46, %48 : vector<64x128xf32>
    %cst_37 = arith.constant 0.000000e+00 : f32
    %50 = vector.broadcast %cst_37 : f32 to vector<64x128xf32>
    %51 = arith.maximumf %49, %50 : vector<64x128xf32>
    %52 = arith.truncf %51 : vector<64x128xf32> to vector<64x128xbf16>
    %c0_38 = arith.constant 0 : index
    %c384 = arith.constant 384 : index
    %53 = vector.load %arg9[%c0_38, %c384] : memref<64x512xbf16, #tpu.memory_space<vmem>>, vector<64x128xbf16>
    tpu.vector_store %arg9[%c0_38, %c384], %52 {strides = array<i32>} : memref<64x512xbf16, #tpu.memory_space<vmem>>, vector<64x128xbf16>,
    %c0_39 = arith.constant 0 : index
    %c0_40 = arith.constant 0 : index
    %54 = vector.load %arg5[%c0_39, %c0_40] : memref<4x64xbf16, #tpu.memory_space<vmem>>, vector<4x64xbf16>
    %c0_41 = arith.constant 0 : index
    %c0_42 = arith.constant 0 : index
    %55 = vector.load %arg9[%c0_41, %c0_42] : memref<64x512xbf16, #tpu.memory_space<vmem>>, vector<64x512xbf16>
    %cst_43 = arith.constant dense<0.000000e+00> : vector<4x512xf32>
    %56 = tpu.matmul %54, %55, %cst_43 {dimension_numbers = #tpu.dot_dimension_numbers<[1], [0], [0], [1], [0, 0, 1, 1], [], []>} : vector<4x64xbf16>, vector<64x512xbf16>, vector<4x512xf32> -> vector<4x512xf32>
    %c0_44 = arith.constant 0 : index
    %c0_45 = arith.constant 0 : index
    %57 = vector.load %arg6[%c0_44, %c0_45] : memref<1x1xf32, #tpu.memory_space<vmem>>, vector<1x1xf32>
    %58 = vector.broadcast %57 : vector<1x1xf32> to vector<4x512xf32>
    %59 = arith.addf %56, %58 : vector<4x512xf32>
    %60 = arith.negf %59 : vector<4x512xf32>
    %61 = math.exp %60 : vector<4x512xf32>
    %cst_46 = arith.constant 1.000000e+00 : f32
    %62 = vector.broadcast %cst_46 : f32 to vector<4x512xf32>
    %63 = arith.addf %62, %61 : vector<4x512xf32>
    %64 = arith.divf %62, %63 : vector<4x512xf32>
    %c0_47 = arith.constant 0 : index
    %c0_48 = arith.constant 0 : index
    %65 = vector.load %arg7[%c0_47, %c0_48] : memref<4x512xf32, #tpu.memory_space<vmem>>, vector<4x512xf32>
    tpu.vector_store %arg7[%c0_47, %c0_48], %64 {strides = array<i32>} : memref<4x512xf32, #tpu.memory_space<vmem>>, vector<4x512xf32>,
    return
  }
  func.func @transform_0(%arg0: i32) -> (i32, i32) {
    %c0_i32 = arith.constant 0 : i32
    %c0_i32_0 = arith.constant 0 : i32
    %c0_i32_1 = arith.constant 0 : i32
    return %c0_i32, %c0_i32_0 : i32, i32
  }
  func.func @transform_1(%arg0: i32) -> (i32, i32) {
    %c0_i32 = arith.constant 0 : i32
    %c0_i32_0 = arith.constant 0 : i32
    %c0_i32_1 = arith.constant 0 : i32
    return %c0_i32, %c0_i32_0 : i32, i32
  }
  func.func @transform_2(%arg0: i32) -> (i32, i32) {
    %c0_i32 = arith.constant 0 : i32
    %c0_i32_0 = arith.constant 0 : i32
    %c0_i32_1 = arith.constant 0 : i32
    return %c0_i32, %c0_i32_0 : i32, i32
  }
  func.func @transform_3(%arg0: i32) -> (i32, i32) {
    %c0_i32 = arith.constant 0 : i32
    %c0_i32_0 = arith.constant 0 : i32
    %c0_i32_1 = arith.constant 0 : i32
    return %c0_i32, %c0_i32_0 : i32, i32
  }
  func.func @transform_4(%arg0: i32) -> (i32, i32) {
    %c0_i32 = arith.constant 0 : i32
    %c0_i32_0 = arith.constant 0 : i32
    %c0_i32_1 = arith.constant 0 : i32
    return %c0_i32, %c0_i32_0 : i32, i32
  }
  func.func @transform_5(%arg0: i32) -> (i32, i32) {
    %c0_i32 = arith.constant 0 : i32
    %c0_i32_0 = arith.constant 0 : i32
    %c0_i32_1 = arith.constant 0 : i32
    return %c0_i32, %c0_i32_0 : i32, i32
  }
  func.func @transform_6(%arg0: i32) -> (i32, i32) {
    %c0_i32 = arith.constant 0 : i32
    %c0_i32_0 = arith.constant 0 : i32
    %c0_i32_1 = arith.constant 0 : i32
    return %c0_i32, %c0_i32_0 : i32, i32
  }
}

</mosaic_0001>

<bundles_post_ra>
// kernel: generator_forward.1
= control target key start
LH: loop header
LB: loop body
LE: loop exit
PB: predicated region body
PF: predicated region fallthrough
CT: control target
= control target key end

     0   :  { %s3826_s0 = inlined_call_operand.vmem [shape: bf16[32,640], index: 0, kind: input, shape index: {}]   ;;  %s3827_s1 = inlined_call_operand.hbm [shape: bf16[640,512], index: 1, kind: input, shape index: {}]   ;;  %s3828_s2 = inlined_call_operand.vmem [shape: bf16[256,128], index: 2, kind: input, shape index: {}]   ;;  %s3829_s3 = inlined_call_operand.vmem [shape: f32[64,1], index: 3, kind: input, shape index: {}]   ;;  %s3830_s4 = inlined_call_operand.vmem [shape: bf16[4,64], index: 4, kind: input, shape index: {}]   ;;  %s3831_s5 = inlined_call_operand.<no memory space> [shape: f32[1,1], index: 5, kind: input, shape index: {}]   ;;  %s3832_s6 = inlined_call_operand.vmem [shape: f32[4,512], index: 6, kind: output, shape index: {}]  }
   0x1   :  { %v11_v0 = vstv %s3831_s5 }
   0x2   :  { %12 = vst [vmem:[#allocation4] sm:$0x1] %v11_v0 }
   0x3   :  { %13 = vsyncpa [#allocation6], 0  ;;  %s20_s25 = sshll.u32 %s3827_s1, 4  ;;  %s3499_s26 = smov [#allocation5]   ;;  %s21_s25 = int_to_ptr.hbm [resolvable:$true] %s20_s25 }
   0x4   :  { %s22_s27 = sshll.u32 %s3499_s26, 4  ;;  %s3500_s28 = smov 256   ;;  %s23_s27 = int_to_ptr.vmem [resolvable:$true] %s22_s27 }
   0x5   :  { %s3501_s29 = smov 16  }
   0x6   :  { %28 = dma.hbm_to_vmem [thread:$0]  %s21_s25, 20480, %s23_s27, [#allocation6], %s3500_s28, %s3500_s28, %s3501_s29  }
   0x7   :  { %3497 = dma.done.wait [#allocation6], 20480  }
   0x8   :  { %3498 = vsyncadd [#allocation6], 4294946816  ;;  %v2498_v1 = vld [vmem:[#allocation5 + $0xe0] sm:$0xf]  ;;  %v3232_v2 = vld [vmem:[#allocation5 + $0xec] sm:$0xf0] }
   0x9   :  { %v2626_v3 = vld [vmem:[#allocation5 + $0x1e0] sm:$0xf]  ;;  %v2499_v4 = vor.u32 %v3232_v2, %v2498_v1  ;;  %v3264_v5 = vld [vmem:[#allocation5 + $0x1ec] sm:$0xf0]  ;;  %vm2194_vm0 = vcmask 523264   ;;  %vm2332_vm8 = vcmask 1043456  }
   0xa   :  { %v2754_v6 = vld [vmem:[#allocation5 + $0x2e0] sm:$0xf]  ;;  %v3296_v7 = vld [vmem:[#allocation5 + $0x2ec] sm:$0xf0]  ;;  %v2627_v8 = vor.u32 %v3264_v5, %v2626_v3 }
   0xb   :  { %v2755_v9 = vor.u32 %v3296_v7, %v2754_v6  ;;  %v2882_v10 = vld [vmem:[#allocation5 + $0x3e0] sm:$0xf]  ;;  %v3328_v11 = vld [vmem:[#allocation5 + $0x3ec] sm:$0xf0]  ;;  %1066 = vmatpush.bf16.msra.mxu0 %v2499_v4 }
   0xc   :  { %v2482_v12 = vld [vmem:[#allocation5 + $0xc0] sm:$0xf]  ;;  %v2883_v13 = vor.u32 %v3328_v11, %v2882_v10  ;;  %v3228_v14 = vld [vmem:[#allocation5 + $0xcc] sm:$0xf0]  ;;  %1085 = vmatpush.bf16.msra.mxu1 %v2627_v8 }
   0xd   :  { %v2610_v15 = vld [vmem:[#allocation5 + $0x1c0] sm:$0xf]  ;;  %v3260_v16 = vld [vmem:[#allocation5 + $0x1cc] sm:$0xf0]  ;;  %1104 = vmatpush.bf16.msra.mxu2 %v2755_v9  ;;  %v2483_v17 = vor.u32 %v3228_v14, %v2482_v12 }
   0xe   :  { %v2611_v18 = vor.u32 %v3260_v16, %v2610_v15  ;;  %v2738_v19 = vld [vmem:[#allocation5 + $0x2c0] sm:$0xf]  ;;  %v3292_v20 = vld [vmem:[#allocation5 + $0x2cc] sm:$0xf0]  ;;  %1123 = vmatpush.bf16.msra.mxu3 %v2883_v13 }
   0xf   :  { %v2866_v21 = vld [vmem:[#allocation5 + $0x3c0] sm:$0xf]  ;;  %v2739_v22 = vor.u32 %v3292_v20, %v2738_v19  ;;  %v3324_v23 = vld [vmem:[#allocation5 + $0x3cc] sm:$0xf0]  ;;  %1067 = vmatpush.bf16.msra.mxu0 %v2483_v17 }
  0x10   :  { %v2466_v24 = vld [vmem:[#allocation5 + $0xa0] sm:$0xf]  ;;  %v3224_v25 = vld [vmem:[#allocation5 + $0xac] sm:$0xf0]  ;;  %v2867_v26 = vor.u32 %v3324_v23, %v2866_v21  ;;  %1086 = vmatpush.bf16.msra.mxu1 %v2611_v18 }
  0x11   :  { %v2594_v27 = vld [vmem:[#allocation5 + $0x1a0] sm:$0xf]  ;;  %v3256_v28 = vld [vmem:[#allocation5 + $0x1ac] sm:$0xf0]  ;;  %v2467_v30 = vor.u32 %v3224_v25, %v2466_v24  ;;  %1105 = vmatpush.bf16.msra.mxu2 %v2739_v22 }
  0x12   :  { %v2722_v29 = vld [vmem:[#allocation5 + $0x2a0] sm:$0xf]  ;;  %v3288_v31 = vld [vmem:[#allocation5 + $0x2ac] sm:$0xf0]  ;;  %v2595_v34 = vor.u32 %v3256_v28, %v2594_v27  ;;  %1124 = vmatpush.bf16.msra.mxu3 %v2867_v26 }
  0x13   :  { %v2850_v32 = vld [vmem:[#allocation5 + $0x3a0] sm:$0xf]  ;;  %v3320_v33 = vld [vmem:[#allocation5 + $0x3ac] sm:$0xf0]  ;;  %v2723_v35 = vor.u32 %v3288_v31, %v2722_v29  ;;  %1068 = vmatpush.bf16.msra.mxu0 %v2467_v30 }
  0x14   :  { %v2450_v36 = vld [vmem:[#allocation5 + $0x80] sm:$0xf]  ;;  %v3220_v37 = vld [vmem:[#allocation5 + $0x8c] sm:$0xf0]  ;;  %v2851_v39 = vor.u32 %v3320_v33, %v2850_v32  ;;  %1087 = vmatpush.bf16.msra.mxu1 %v2595_v34  ;;  %v2348_v32 = vld [vmem:[%s3826_s0 + $0x14] sm:$0xf0] }
  0x15   :  { %v2578_v38 = vld [vmem:[#allocation5 + $0x180] sm:$0xf]  ;;  %v3252_v40 = vld [vmem:[#allocation5 + $0x18c] sm:$0xf0]  ;;  %v2451_v45 = vor.u32 %v3220_v37, %v2450_v36  ;;  %1106 = vmatpush.bf16.msra.mxu2 %v2723_v35  ;;  %v2354_v36 = vld [vmem:[%s3826_s0 + $0x8] sm:$0xf] }
  0x16   :  { %v2706_v41 = vld [vmem:[#allocation5 + $0x280] sm:$0xf]  ;;  %v3284_v42 = vld [vmem:[#allocation5 + $0x28c] sm:$0xf0]  ;;  %v2579_v46 = vor.u32 %v3252_v40, %v2578_v38  ;;  %1125 = vmatpush.bf16.msra.mxu3 %v2851_v39  ;;  %v3230_v37 = vld [vmem:[#allocation5 + $0xe4] sm:$0xf] }
  0x17   :  { %v2834_v43 = vld [vmem:[#allocation5 + $0x380] sm:$0xf]  ;;  %v3316_v44 = vld [vmem:[#allocation5 + $0x38c] sm:$0xf0]  ;;  %v2707_v47 = vor.u32 %v3284_v42, %v2706_v41  ;;  %1069 = vmatpush.bf16.msra.mxu0 %v2451_v45  ;;  %v2500_v38 = vld [vmem:[#allocation5 + $0xf0] sm:$0xf0] }
  0x18   :  { %v2434_v48 = vld [vmem:[#allocation5 + $0x60] sm:$0xf]  ;;  %v3216_v49 = vld [vmem:[#allocation5 + $0x6c] sm:$0xf0]  ;;  %v2835_v51 = vor.u32 %v3316_v44, %v2834_v43  ;;  %1088 = vmatpush.bf16.msra.mxu1 %v2579_v46  ;;  %v3195_v41 = vld [vmem:[%s3826_s0 + $0x18] sm:$0xf0] }
  0x19   :  { %v2562_v50 = vld [vmem:[#allocation5 + $0x160] sm:$0xf]  ;;  %v3248_v52 = vld [vmem:[#allocation5 + $0x16c] sm:$0xf0]  ;;  %v2435_v57 = vor.u32 %v3216_v49, %v2434_v48  ;;  %1107 = vmatpush.bf16.msra.mxu2 %v2707_v47  ;;  %v3193_v42 = vld [vmem:[%s3826_s0 + $0xc] sm:$0xf] }
  0x1a   :  { %v2690_v53 = vld [vmem:[#allocation5 + $0x260] sm:$0xf]  ;;  %v3280_v54 = vld [vmem:[#allocation5 + $0x26c] sm:$0xf0]  ;;  %v2563_v58 = vor.u32 %v3248_v52, %v2562_v50  ;;  %1126 = vmatpush.bf16.msra.mxu3 %v2835_v51  ;;  %v3262_v46 = vld [vmem:[#allocation5 + $0x1e4] sm:$0xf]  ;;  %v2503_v50 = vor.u32 %v3230_v37, %v2500_v38 }
  0x1b   :  { %v2818_v55 = vld [vmem:[#allocation5 + $0x360] sm:$0xf]  ;;  %v3312_v56 = vld [vmem:[#allocation5 + $0x36c] sm:$0xf0]  ;;  %v2691_v59 = vor.u32 %v3280_v54, %v2690_v53  ;;  %1070 = vmatpush.bf16.msra.mxu0 %v2435_v57  ;;  %v2628_v47 = vld [vmem:[#allocation5 + $0x1f0] sm:$0xf0] }
  0x1c   :  { %v2418_v60 = vld [vmem:[#allocation5 + $0x40] sm:$0xf]  ;;  %v3212_v61 = vld [vmem:[#allocation5 + $0x4c] sm:$0xf0]  ;;  %v2819_v63 = vor.u32 %v3312_v56, %v2818_v55  ;;  %1089 = vmatpush.bf16.msra.mxu1 %v2563_v58  ;;  %v3294_v48 = vld [vmem:[#allocation5 + $0x2e4] sm:$0xf]  ;;  %v3572_v55 = vor.u32 %v3195_v41, %v2354_v36 }
  0x1d   :  { %v2546_v62 = vld [vmem:[#allocation5 + $0x140] sm:$0xf]  ;;  %v3244_v0 = vld [vmem:[#allocation5 + $0x14c] sm:$0xf0]  ;;  %v2419_v5 = vor.u32 %v3212_v61, %v2418_v60  ;;  %1108 = vmatpush.bf16.msra.mxu2 %v2691_v59  ;;  %v2756_v51 = vld [vmem:[#allocation5 + $0x2f0] sm:$0xf0]  ;;  %v2631_v59 = vor.u32 %v3262_v46, %v2628_v47 }
  0x1e   :  { %v2674_v1 = vld [vmem:[#allocation5 + $0x240] sm:$0xf]  ;;  %v3276_v2 = vld [vmem:[#allocation5 + $0x24c] sm:$0xf0]  ;;  %v2547_v6 = vor.u32 %v3244_v0, %v2546_v62  ;;  %1127 = vmatpush.bf16.msra.mxu3 %v2819_v63  ;;  %v3226_v56 = vld [vmem:[#allocation5 + $0xc4] sm:$0xf]  ;;  %v2759_v60 = vor.u32 %v3294_v48, %v2756_v51 }
  0x1f   :  { %v2802_v3 = vld [vmem:[#allocation5 + $0x340] sm:$0xf]  ;;  %v3308_v4 = vld [vmem:[#allocation5 + $0x34c] sm:$0xf0]  ;;  %v2675_v7 = vor.u32 %v3276_v2, %v2674_v1  ;;  %1071 = vmatpush.bf16.msra.mxu0 %v2419_v5  ;;  %v2484_v57 = vld [vmem:[#allocation5 + $0xd0] sm:$0xf0] }
  0x20   :  { %v2402_v8 = vld [vmem:[#allocation5 + $0x20] sm:$0xf]  ;;  %v3208_v9 = vld [vmem:[#allocation5 + $0x2c] sm:$0xf0]  ;;  %v2803_v11 = vor.u32 %v3308_v4, %v2802_v3  ;;  %1090 = vmatpush.bf16.msra.mxu1 %v2547_v6  ;;  %v3258_v62 = vld [vmem:[#allocation5 + $0x1c4] sm:$0xf]  ;;  %v2487_v1 = vor.u32 %v3226_v56, %v2484_v57 }
  0x21   :  { %v2530_v10 = vld [vmem:[#allocation5 + $0x120] sm:$0xf]  ;;  %v3240_v12 = vld [vmem:[#allocation5 + $0x12c] sm:$0xf0]  ;;  %v2403_v18 = vor.u32 %v3208_v9, %v2402_v8  ;;  %1109 = vmatpush.bf16.msra.mxu2 %v2675_v7  ;;  %v2612_v63 = vld [vmem:[#allocation5 + $0x1d0] sm:$0xf0] }
  0x22   :  { %v2658_v13 = vld [vmem:[#allocation5 + $0x220] sm:$0xf]  ;;  %v3272_v14 = vld [vmem:[#allocation5 + $0x22c] sm:$0xf0]  ;;  %v2531_v22 = vor.u32 %v3240_v12, %v2530_v10  ;;  %1128 = vmatpush.bf16.msra.mxu3 %v2803_v11  ;;  %v3290_v0 = vld [vmem:[#allocation5 + $0x2c4] sm:$0xf]  ;;  %v2615_v7 = vor.u32 %v3258_v62, %v2612_v63 }
  0x23   :  { %v2786_v15 = vld [vmem:[#allocation5 + $0x320] sm:$0xf]  ;;  %v3304_v16 = vld [vmem:[#allocation5 + $0x32c] sm:$0xf0]  ;;  %v2659_v23 = vor.u32 %v3272_v14, %v2658_v13  ;;  %1072 = vmatpush.bf16.msra.mxu0 %v2403_v18  ;;  %v2740_v2 = vld [vmem:[#allocation5 + $0x2d0] sm:$0xf0] }
  0x24   :  { %v2386_v17 = vld [vmem:[#allocation5] sm:$0xf]  ;;  %v3204_v19 = vld [vmem:[#allocation5 + $0xc] sm:$0xf0]  ;;  %v2787_v27 = vor.u32 %v3304_v16, %v2786_v15  ;;  %1091 = vmatpush.bf16.msra.mxu1 %v2531_v22  ;;  %v3222_v5 = vld [vmem:[#allocation5 + $0xa4] sm:$0xf]  ;;  %v2743_v8 = vor.u32 %v3290_v0, %v2740_v2 }
  0x25   :  { %v2514_v20 = vld [vmem:[#allocation5 + $0x100] sm:$0xf]  ;;  %v3236_v21 = vld [vmem:[#allocation5 + $0x10c] sm:$0xf0]  ;;  %v2387_v35 = vor.u32 %v3204_v19, %v2386_v17  ;;  %1110 = vmatpush.bf16.msra.mxu2 %v2659_v23  ;;  %v2468_v6 = vld [vmem:[#allocation5 + $0xb0] sm:$0xf0] }
  0x26   :  { %v2642_v24 = vld [vmem:[#allocation5 + $0x200] sm:$0xf]  ;;  %v3268_v25 = vld [vmem:[#allocation5 + $0x20c] sm:$0xf0]  ;;  %v2515_v39 = vor.u32 %v3236_v21, %v2514_v20  ;;  %1129 = vmatpush.bf16.msra.mxu3 %v2787_v27  ;;  %v3254_v10 = vld [vmem:[#allocation5 + $0x1a4] sm:$0xf]  ;;  %v2471_v13 = vor.u32 %v3222_v5, %v2468_v6 }
  0x27   :  { %v2770_v26 = vld [vmem:[#allocation5 + $0x300] sm:$0xf]  ;;  %v3300_v28 = vld [vmem:[#allocation5 + $0x30c] sm:$0xf0]  ;;  %v2643_v40 = vor.u32 %v3268_v25, %v2642_v24  ;;  %1073 = vmatpush.bf16.msra.mxu0 %v2387_v35  ;;  %v2596_v11 = vld [vmem:[#allocation5 + $0x1b0] sm:$0xf0] }
  0x28   :  { %v2346_v29 = vld [vmem:[%s3826_s0] sm:$0xf]  ;;  %v3194_v30 = vld [vmem:[%s3826_s0 + $0x10] sm:$0xf0]  ;;  %v3192_v31 = vld [vmem:[%s3826_s0 + $0x4] sm:$0xf]  ;;  %v2771_v44 = vor.u32 %v3300_v28, %v2770_v26  ;;  %1092 = vmatpush.bf16.msra.mxu1 %v2515_v39  ;;  %v2599_v19 = vor.u32 %v3254_v10, %v2596_v11 }
  0x29   :  { %v3010_v33 = vld [vmem:[#allocation5 + $0x4e0] sm:$0xf]  ;;  %v3360_v34 = vld [vmem:[#allocation5 + $0x4ec] sm:$0xf0]  ;;  %v3568_v49 = vor.u32 %v3194_v30, %v2346_v29  ;;  %v3570_v54 = vor.u32 %v3192_v31, %v2348_v32  ;;  %1111 = vmatpush.bf16.msra.mxu2 %v2643_v40  ;;  %v3286_v12 = vld [vmem:[#allocation5 + $0x2a4] sm:$0xf] }
  0x2a   :  { %v2356_v43 = vld [vmem:[%s3826_s0 + $0x1c] sm:$0xf0]  ;;  %v3011_v45 = vor.u32 %v3360_v34, %v3010_v33  ;;  %v3356_v53 = vld [vmem:[#allocation5 + $0x4cc] sm:$0xf0]  ;;  %1130 = vmatpush.bf16.msra.mxu3 %v2771_v44  ;;  %v2724_v14 = vld [vmem:[#allocation5 + $0x2b0] sm:$0xf0] }
  0x2b   :  { %v2994_v52 = vld [vmem:[#allocation5 + $0x4c0] sm:$0xf]  ;;  %v3574_v58 = vor.u32 %v3193_v42, %v2356_v43  ;;  %1074 = vmatmul.bf16.vlgmr.msra.gmra.mxu0 %v3568_v49  ;;  %v3352_v4 = vld [vmem:[#allocation5 + $0x4ac] sm:$0xf0]  ;;  %1093 = vmatmul.bf16.vlgmr.msra.gmra.mxu1 %v3570_v54  ;;  %v3218_v17 = vld [vmem:[#allocation5 + $0x84] sm:$0xf]  ;;  %v2727_v23 = vor.u32 %v3286_v12, %v2724_v14 }
  0x2c   :  { %1142 = vmatpush.bf16.msrb.mxu0 %v3011_v45  ;;  %v2995_v61 = vor.u32 %v3356_v53, %v2994_v52  ;;  %1161 = vmatpush.bf16.msrb.mxu1 %v2503_v50  ;;  %v2978_v3 = vld [vmem:[#allocation5 + $0x4a0] sm:$0xf]  ;;  %v3348_v16 = vld [vmem:[#allocation5 + $0x48c] sm:$0xf0]  ;;  %v2452_v18 = vld [vmem:[#allocation5 + $0x90] sm:$0xf0] }
  0x2d   :  { %1112 = vmatmul.bf16.vlgmr.msra.gmra.mxu2 %v3572_v55  ;;  %1131 = vmatmul.bf16.vlgmr.msra.gmra.mxu3 %v3574_v58  ;;  %v2979_v9 = vor.u32 %v3352_v4, %v2978_v3  ;;  %v2962_v15 = vld [vmem:[#allocation5 + $0x480] sm:$0xf]  ;;  %v3250_v20 = vld [vmem:[#allocation5 + $0x184] sm:$0xf]  ;;  %v2580_v21 = vld [vmem:[#allocation5 + $0x190] sm:$0xf0]  ;;  %v2455_v28 = vor.u32 %v3218_v17, %v2452_v18 }
  0x2e   :  { %1180 = vmatpush.bf16.msrb.mxu2 %v2631_v59  ;;  %1199 = vmatpush.bf16.msrb.mxu3 %v2759_v60  ;;  %v3282_v22 = vld [vmem:[#allocation5 + $0x284] sm:$0xf]  ;;  %v2963_v24 = vor.u32 %v3348_v16, %v2962_v15  ;;  %v2708_v25 = vld [vmem:[#allocation5 + $0x290] sm:$0xf0]  ;;  %v3199_v27 = vld [vmem:[%s3826_s0 + $0x38] sm:$0xf0]  ;;  %v2583_v36 = vor.u32 %v3250_v20, %v2580_v21 }
  0x2f   :  { %v2366_v26 = vld [vmem:[%s3826_s0 + $0x28] sm:$0xf]  ;;  %v3197_v29 = vld [vmem:[%s3826_s0 + $0x2c] sm:$0xf]  ;;  %v2368_v30 = vld [vmem:[%s3826_s0 + $0x3c] sm:$0xf0]  ;;  %v2711_v40 = vor.u32 %v3282_v22, %v2708_v25 }
  0x30   :  { %1143 = vmatpush.bf16.msrb.mxu0 %v2995_v61  ;;  %1162 = vmatpush.bf16.msrb.mxu1 %v2487_v1  ;;  %v2946_v31 = vld [vmem:[#allocation5 + $0x460] sm:$0xf]  ;;  %v3344_v32 = vld [vmem:[#allocation5 + $0x46c] sm:$0xf0]  ;;  %v3214_v34 = vld [vmem:[#allocation5 + $0x64] sm:$0xf]  ;;  %v3604_v45 = vor.u32 %v3199_v27, %v2366_v26  ;;  %v3606_v51 = vor.u32 %v3197_v29, %v2368_v30 }
  0x31   :  { %v2374_v33 = vld [vmem:[%s3826_s0 + $0x30] sm:$0xf]  ;;  %v2436_v35 = vld [vmem:[#allocation5 + $0x70] sm:$0xf0]  ;;  %v3200_v37 = vld [vmem:[%s3826_s0 + $0x40] sm:$0xf0]  ;;  %v2947_v41 = vor.u32 %v3344_v32, %v2946_v31 }
  0x32   :  { %1181 = vmatpush.bf16.msrb.mxu2 %v2615_v7  ;;  %1200 = vmatpush.bf16.msrb.mxu3 %v2743_v8  ;;  %v3198_v38 = vld [vmem:[%s3826_s0 + $0x34] sm:$0xf]  ;;  %v2376_v39 = vld [vmem:[%s3826_s0 + $0x44] sm:$0xf0]  ;;  %v2439_v46 = vor.u32 %v3214_v34, %v2436_v35  ;;  %v2930_v48 = vld [vmem:[#allocation5 + $0x440] sm:$0xf]  ;;  %v3608_v52 = vor.u32 %v3200_v37, %v2374_v33 }
  0x33   :  { %v3246_v42 = vld [vmem:[#allocation5 + $0x164] sm:$0xf]  ;;  %v2564_v43 = vld [vmem:[#allocation5 + $0x170] sm:$0xf0]  ;;  %v3340_v50 = vld [vmem:[#allocation5 + $0x44c] sm:$0xf0]  ;;  %v3610_v57 = vor.u32 %v3198_v38, %v2376_v39 }
  0x34   :  { %1144 = vmatpush.bf16.msrb.mxu0 %v2979_v9  ;;  %1163 = vmatpush.bf16.msrb.mxu1 %v2471_v13  ;;  %v3278_v44 = vld [vmem:[#allocation5 + $0x264] sm:$0xf]  ;;  %v2692_v47 = vld [vmem:[#allocation5 + $0x270] sm:$0xf0]  ;;  %v2567_v59 = vor.u32 %v3246_v42, %v2564_v43  ;;  %v2931_v61 = vor.u32 %v3340_v50, %v2930_v48  ;;  %v2914_v3 = vld [vmem:[#allocation5 + $0x420] sm:$0xf] }
  0x35   :  { %v3210_v53 = vld [vmem:[#allocation5 + $0x44] sm:$0xf]  ;;  %v2420_v56 = vld [vmem:[#allocation5 + $0x50] sm:$0xf0]  ;;  %v2695_v60 = vor.u32 %v3278_v44, %v2692_v47  ;;  %v3336_v4 = vld [vmem:[#allocation5 + $0x42c] sm:$0xf0] }
  0x36   :  { %1182 = vmatpush.bf16.msrb.mxu2 %v2599_v19  ;;  %1201 = vmatpush.bf16.msrb.mxu3 %v2727_v23  ;;  %v3242_v62 = vld [vmem:[#allocation5 + $0x144] sm:$0xf]  ;;  %v2548_v63 = vld [vmem:[#allocation5 + $0x150] sm:$0xf0]  ;;  %v2423_v1 = vor.u32 %v3210_v53, %v2420_v56  ;;  %v2915_v10 = vor.u32 %v3336_v4, %v2914_v3  ;;  %v2898_v15 = vld [vmem:[#allocation5 + $0x400] sm:$0xf] }
  0x37   :  { %v3274_v0 = vld [vmem:[#allocation5 + $0x244] sm:$0xf]  ;;  %v2676_v2 = vld [vmem:[#allocation5 + $0x250] sm:$0xf0]  ;;  %v2551_v7 = vor.u32 %v3242_v62, %v2548_v63  ;;  %v3332_v16 = vld [vmem:[#allocation5 + $0x40c] sm:$0xf0] }
  0x38   :  { %1145 = vmatpush.bf16.msrb.mxu0 %v2963_v24  ;;  %1164 = vmatpush.bf16.msrb.mxu1 %v2455_v28  ;;  %v3206_v5 = vld [vmem:[#allocation5 + $0x24] sm:$0xf]  ;;  %v2404_v6 = vld [vmem:[#allocation5 + $0x30] sm:$0xf0]  ;;  %v2679_v9 = vor.u32 %v3274_v0, %v2676_v2  ;;  %v2899_v26 = vor.u32 %v3332_v16, %v2898_v15  ;;  %v2362_v31 = vld [vmem:[%s3826_s0 + $0x10] sm:$0xf] }
  0x39   :  { %v3238_v8 = vld [vmem:[#allocation5 + $0x124] sm:$0xf]  ;;  %v2532_v11 = vld [vmem:[#allocation5 + $0x130] sm:$0xf0]  ;;  %v2407_v14 = vor.u32 %v3206_v5, %v2404_v6  ;;  %v2506_v33 = vld [vmem:[#allocation5 + $0xe8] sm:$0xf] }
  0x3a   :  { %1183 = vmatpush.bf16.msrb.mxu2 %v2583_v36  ;;  %1202 = vmatpush.bf16.msrb.mxu3 %v2711_v40  ;;  %v3270_v12 = vld [vmem:[#allocation5 + $0x224] sm:$0xf]  ;;  %v2660_v13 = vld [vmem:[#allocation5 + $0x230] sm:$0xf0]  ;;  %v2535_v21 = vor.u32 %v3238_v8, %v2532_v11  ;;  %v3233_v34 = vld [vmem:[#allocation5 + $0xf4] sm:$0xf0] }
  0x3b   :  { %1079 = vmatmul.bf16.gmra.mxu0 %v3604_v45  ;;  %1098 = vmatmul.bf16.gmra.mxu1 %v3606_v51  ;;  %v3202_v17 = vld [vmem:[#allocation5 + $0x4] sm:$0xf]  ;;  %v2388_v18 = vld [vmem:[#allocation5 + $0x10] sm:$0xf0]  ;;  %v2663_v25 = vor.u32 %v3270_v12, %v2660_v13  ;;  %v2634_v37 = vld [vmem:[#allocation5 + $0x1e8] sm:$0xf] }
  0x3c   :  { %1146 = vmatpush.bf16.msrb.mxu0 %v2947_v41  ;;  %1165 = vmatpush.bf16.msrb.mxu1 %v2439_v46  ;;  %v3326_v19 = vld [vmem:[#allocation5 + $0x3e4] sm:$0xf]  ;;  %v2884_v20 = vld [vmem:[#allocation5 + $0x3f0] sm:$0xf0]  ;;  %v2391_v30 = vor.u32 %v3202_v17, %v2388_v18  ;;  %v3265_v38 = vld [vmem:[#allocation5 + $0x1f4] sm:$0xf0]  ;;  %v2507_v41 = vor.u32 %v3233_v34, %v2506_v33 }
  0x3d   :  { %1117 = vmatmul.bf16.gmra.mxu2 %v3608_v52  ;;  %1136 = vmatmul.bf16.gmra.mxu3 %v3610_v57  ;;  %v3234_v22 = vld [vmem:[#allocation5 + $0x104] sm:$0xf]  ;;  %v3012_v24 = vld [vmem:[#allocation5 + $0x4f0] sm:$0xf0]  ;;  %v2887_v32 = vor.u32 %v3326_v19, %v2884_v20  ;;  %v2635_v47 = vor.u32 %v3265_v38, %v2634_v37  ;;  %v2490_v50 = vld [vmem:[#allocation5 + $0xc8] sm:$0xf] }
  0x3e   :  { %1184 = vmatpush.bf16.msrb.mxu2 %v2567_v59  ;;  %1203 = vmatpush.bf16.msrb.mxu3 %v2695_v60  ;;  %v3358_v23 = vld [vmem:[#allocation5 + $0x4e4] sm:$0xf]  ;;  %v2516_v27 = vld [vmem:[#allocation5 + $0x110] sm:$0xf0]  ;;  %v3229_v53 = vld [vmem:[#allocation5 + $0xd4] sm:$0xf0] }
  0x3f   :  { %v3266_v28 = vld [vmem:[#allocation5 + $0x204] sm:$0xf]  ;;  %v2644_v29 = vld [vmem:[#allocation5 + $0x210] sm:$0xf0]  ;;  %v3015_v36 = vor.u32 %v3358_v23, %v3012_v24  ;;  %v2519_v39 = vor.u32 %v3234_v22, %v2516_v27  ;;  %v2618_v56 = vld [vmem:[#allocation5 + $0x1c8] sm:$0xf]  ;;  %v2491_v62 = vor.u32 %v3229_v53, %v2490_v50 }
  0x40   :  { %1147 = vmatpush.bf16.msrb.mxu0 %v2931_v61  ;;  %1166 = vmatpush.bf16.msrb.mxu1 %v2423_v1  ;;  %v3196_v35 = vld [vmem:[%s3826_s0 + $0x20] sm:$0xf0]  ;;  %v2647_v40 = vor.u32 %v3266_v28, %v2644_v29  ;;  %v2868_v43 = vld [vmem:[#allocation5 + $0x3d0] sm:$0xf0]  ;;  %v3261_v59 = vld [vmem:[#allocation5 + $0x1d4] sm:$0xf0] }
  0x41   :  { %v3322_v42 = vld [vmem:[#allocation5 + $0x3c4] sm:$0xf]  ;;  %v3622_v46 = vor.u32 %v3196_v35, %v2362_v31  ;;  %v2996_v48 = vld [vmem:[#allocation5 + $0x4d0] sm:$0xf0]  ;;  %v2619_v2 = vor.u32 %v3261_v59, %v2618_v56  ;;  %v2474_v4 = vld [vmem:[#allocation5 + $0xa8] sm:$0xf] }
  0x42   :  { %1185 = vmatpush.bf16.msrb.mxu2 %v2551_v7  ;;  %1204 = vmatpush.bf16.msrb.mxu3 %v2679_v9  ;;  %v3354_v44 = vld [vmem:[#allocation5 + $0x4c4] sm:$0xf]  ;;  %v2871_v60 = vor.u32 %v3322_v42, %v2868_v43  ;;  %v2852_v0 = vld [vmem:[#allocation5 + $0x3b0] sm:$0xf0]  ;;  %v3225_v5 = vld [vmem:[#allocation5 + $0xb4] sm:$0xf0] }
  0x43   :  { %v2999_v61 = vor.u32 %v3354_v44, %v2996_v48  ;;  %v3318_v63 = vld [vmem:[#allocation5 + $0x3a4] sm:$0xf]  ;;  %v2980_v3 = vld [vmem:[#allocation5 + $0x4b0] sm:$0xf0]  ;;  %v2602_v6 = vld [vmem:[#allocation5 + $0x1a8] sm:$0xf] }
  0x44   :  { %1148 = vmatpush.bf16.msrb.mxu0 %v2915_v10  ;;  %1167 = vmatpush.bf16.msrb.mxu1 %v2407_v14  ;;  %v3350_v1 = vld [vmem:[#allocation5 + $0x4a4] sm:$0xf]  ;;  %v3257_v7 = vld [vmem:[#allocation5 + $0x1b4] sm:$0xf0]  ;;  %v2855_v8 = vor.u32 %v3318_v63, %v2852_v0  ;;  %v2475_v10 = vor.u32 %v3225_v5, %v2474_v4  ;;  %v2836_v12 = vld [vmem:[#allocation5 + $0x390] sm:$0xf0] }
  0x45   :  { %v2983_v9 = vor.u32 %v3350_v1, %v2980_v3  ;;  %v3314_v11 = vld [vmem:[#allocation5 + $0x384] sm:$0xf]  ;;  %v2603_v14 = vor.u32 %v3257_v7, %v2602_v6  ;;  %v2964_v15 = vld [vmem:[#allocation5 + $0x490] sm:$0xf0]  ;;  %v2458_v16 = vld [vmem:[#allocation5 + $0x88] sm:$0xf] }
  0x46   :  { %1186 = vmatpush.bf16.msrb.mxu2 %v2535_v21  ;;  %1205 = vmatpush.bf16.msrb.mxu3 %v2663_v25  ;;  %v3346_v13 = vld [vmem:[#allocation5 + $0x484] sm:$0xf]  ;;  %v3221_v17 = vld [vmem:[#allocation5 + $0x94] sm:$0xf0]  ;;  %v2586_v18 = vld [vmem:[#allocation5 + $0x188] sm:$0xf]  ;;  %v2839_v20 = vor.u32 %v3314_v11, %v2836_v12 }
  0x47   :  { %v3253_v19 = vld [vmem:[#allocation5 + $0x194] sm:$0xf0]  ;;  %v2967_v21 = vor.u32 %v3346_v13, %v2964_v15  ;;  %v2459_v22 = vor.u32 %v3221_v17, %v2458_v16  ;;  %v3310_v24 = vld [vmem:[#allocation5 + $0x364] sm:$0xf]  ;;  %v2820_v25 = vld [vmem:[#allocation5 + $0x370] sm:$0xf0] }
  0x48   :  { %1149 = vmatpush.bf16.msrb.mxu0 %v2899_v26  ;;  %1168 = vmatpush.bf16.msrb.mxu1 %v2391_v30  ;;  %v2382_v23 = vld [vmem:[%s3826_s0 + $0x38] sm:$0xf]  ;;  %v3342_v26 = vld [vmem:[#allocation5 + $0x464] sm:$0xf]  ;;  %v2587_v27 = vor.u32 %v3253_v19, %v2586_v18  ;;  %v2442_v29 = vld [vmem:[#allocation5 + $0x68] sm:$0xf]  ;;  %v2823_v34 = vor.u32 %v3310_v24, %v2820_v25 }
  0x49   :  { %v2948_v28 = vld [vmem:[#allocation5 + $0x470] sm:$0xf0]  ;;  %v3217_v30 = vld [vmem:[#allocation5 + $0x74] sm:$0xf0]  ;;  %v3201_v31 = vld [vmem:[%s3826_s0 + $0x48] sm:$0xf0] }
  0x4a   :  { %1187 = vmatpush.bf16.msrb.mxu2 %v2519_v39  ;;  %1206 = vmatpush.bf16.msrb.mxu3 %v2647_v40  ;;  %v3249_v33 = vld [vmem:[#allocation5 + $0x174] sm:$0xf0]  ;;  %v2951_v35 = vor.u32 %v3342_v26, %v2948_v28  ;;  %v3306_v37 = vld [vmem:[#allocation5 + $0x344] sm:$0xf]  ;;  %v2804_v38 = vld [vmem:[#allocation5 + $0x350] sm:$0xf0]  ;;  %v3634_v40 = vor.u32 %v3201_v31, %v2382_v23 }
  0x4b   :  { %1150 = vmatmul.bf16.vlgmr.msrb.gmra.mxu0 %v3622_v46  ;;  %1169 = vmatmul.bf16.vlgmr.msrb.gmra.mxu1 %v3568_v49  ;;  %v3338_v39 = vld [vmem:[#allocation5 + $0x444] sm:$0xf]  ;;  %v2932_v42 = vld [vmem:[#allocation5 + $0x450] sm:$0xf0]  ;;  %v2426_v43 = vld [vmem:[#allocation5 + $0x48] sm:$0xf]  ;;  %v2807_v50 = vor.u32 %v3306_v37, %v2804_v38 }
  0x4c   :  { %1218 = vmatpush.bf16.msra.mxu0 %v2887_v32  ;;  %1237 = vmatpush.bf16.msra.mxu1 %v3015_v36  ;;  %v2570_v32 = vld [vmem:[#allocation5 + $0x168] sm:$0xf]  ;;  %v2443_v36 = vor.u32 %v3217_v30, %v2442_v29  ;;  %v3213_v44 = vld [vmem:[#allocation5 + $0x54] sm:$0xf0]  ;;  %v3302_v53 = vld [vmem:[#allocation5 + $0x324] sm:$0xf]  ;;  %v2935_v56 = vor.u32 %v3338_v39, %v2932_v42 }
  0x4d   :  { %1188 = vmatmul.bf16.vlgmr.msrb.gmra.mxu2 %v3570_v54  ;;  %1207 = vmatmul.bf16.vlgmr.msrb.gmra.mxu3 %v3572_v55  ;;  %v3245_v48 = vld [vmem:[#allocation5 + $0x154] sm:$0xf0]  ;;  %v2427_v59 = vor.u32 %v3213_v44, %v2426_v43  ;;  %v2916_v63 = vld [vmem:[#allocation5 + $0x430] sm:$0xf0]  ;;  %v2410_v0 = vld [vmem:[#allocation5 + $0x28] sm:$0xf] }
  0x4e   :  { %1256 = vmatpush.bf16.msra.mxu2 %v2507_v41  ;;  %1275 = vmatpush.bf16.msra.mxu3 %v2635_v47  ;;  %v2571_v41 = vor.u32 %v3249_v33, %v2570_v32  ;;  %v2554_v47 = vld [vmem:[#allocation5 + $0x148] sm:$0xf]  ;;  %v3209_v1 = vld [vmem:[#allocation5 + $0x34] sm:$0xf0]  ;;  %v3298_v5 = vld [vmem:[#allocation5 + $0x304] sm:$0xf] }
  0x4f   :  { %v3241_v3 = vld [vmem:[#allocation5 + $0x134] sm:$0xf0]  ;;  %v2772_v6 = vld [vmem:[#allocation5 + $0x310] sm:$0xf0]  ;;  %v2394_v11 = vld [vmem:[#allocation5 + $0x8] sm:$0xf] }
  0x50   :  { %1219 = vmatpush.bf16.msra.mxu0 %v2871_v60  ;;  %1238 = vmatpush.bf16.msra.mxu1 %v2999_v61  ;;  %v2788_v60 = vld [vmem:[#allocation5 + $0x330] sm:$0xf0]  ;;  %v3334_v61 = vld [vmem:[#allocation5 + $0x424] sm:$0xf]  ;;  %v3205_v13 = vld [vmem:[#allocation5 + $0x14] sm:$0xf0]  ;;  %v2775_v19 = vor.u32 %v3298_v5, %v2772_v6 }
  0x51   :  { %v2791_v4 = vor.u32 %v3302_v53, %v2788_v60  ;;  %v2919_v7 = vor.u32 %v3334_v61, %v2916_v63  ;;  %v3237_v15 = vld [vmem:[#allocation5 + $0x114] sm:$0xf0]  ;;  %v2762_v16 = vld [vmem:[#allocation5 + $0x2e8] sm:$0xf]  ;;  %v2395_v24 = vor.u32 %v3205_v13, %v2394_v11  ;;  %v3231_v25 = vld [vmem:[#allocation5 + $0xec] sm:$0xf] }
  0x52   :  { %1257 = vmatpush.bf16.msra.mxu2 %v2491_v62  ;;  %1276 = vmatpush.bf16.msra.mxu3 %v2619_v2  ;;  %v2555_v62 = vor.u32 %v3245_v48, %v2554_v47  ;;  %v2538_v2 = vld [vmem:[#allocation5 + $0x128] sm:$0xf]  ;;  %v3297_v17 = vld [vmem:[#allocation5 + $0x2f4] sm:$0xf0]  ;;  %v2508_v26 = vld [vmem:[#allocation5 + $0xf8] sm:$0xf0] }
  0x53   :  { %v2539_v12 = vor.u32 %v3241_v3, %v2538_v2  ;;  %v2890_v18 = vld [vmem:[#allocation5 + $0x3e8] sm:$0xf]  ;;  %v2763_v28 = vor.u32 %v3297_v17, %v2762_v16  ;;  %v2511_v31 = vor.u32 %v3231_v25, %v2508_v26  ;;  %v3293_v33 = vld [vmem:[#allocation5 + $0x2d4] sm:$0xf0]  ;;  %v3227_v38 = vld [vmem:[#allocation5 + $0xcc] sm:$0xf] }
  0x54   :  { %1220 = vmatpush.bf16.msra.mxu0 %v2855_v8  ;;  %1239 = vmatpush.bf16.msra.mxu1 %v2983_v9  ;;  %v2411_v8 = vor.u32 %v3209_v1, %v2410_v0  ;;  %v3330_v9 = vld [vmem:[#allocation5 + $0x404] sm:$0xf]  ;;  %v2746_v32 = vld [vmem:[#allocation5 + $0x2c8] sm:$0xf]  ;;  %v3357_v37 = vld [vmem:[#allocation5 + $0x4d4] sm:$0xf0] }
  0x55   :  { %v2492_v39 = vld [vmem:[#allocation5 + $0xd8] sm:$0xf0]  ;;  %v2730_v44 = vld [vmem:[#allocation5 + $0x2a8] sm:$0xf]  ;;  %v3289_v47 = vld [vmem:[#allocation5 + $0x2b4] sm:$0xf0] }
  0x56   :  { %1258 = vmatpush.bf16.msra.mxu2 %v2475_v10  ;;  %1277 = vmatpush.bf16.msra.mxu3 %v2603_v14  ;;  %v2900_v10 = vld [vmem:[#allocation5 + $0x410] sm:$0xf0]  ;;  %v2522_v14 = vld [vmem:[#allocation5 + $0x108] sm:$0xf]  ;;  %v3321_v53 = vld [vmem:[#allocation5 + $0x3b4] sm:$0xf0] }
  0x57   :  { %v2903_v23 = vor.u32 %v3330_v9, %v2900_v10  ;;  %v2858_v48 = vld [vmem:[#allocation5 + $0x3a8] sm:$0xf]  ;;  %v3223_v60 = vld [vmem:[#allocation5 + $0xac] sm:$0xf]  ;;  %v2476_v61 = vld [vmem:[#allocation5 + $0xb8] sm:$0xf0] }
  0x58   :  { %1221 = vmatpush.bf16.msra.mxu0 %v2839_v20  ;;  %1240 = vmatpush.bf16.msra.mxu1 %v2967_v21  ;;  %v3329_v20 = vld [vmem:[#allocation5 + $0x3f4] sm:$0xf0]  ;;  %v3018_v21 = vld [vmem:[#allocation5 + $0x4e8] sm:$0xf]  ;;  %v2859_v63 = vor.u32 %v3321_v53, %v2858_v48  ;;  %v2460_v9 = vld [vmem:[#allocation5 + $0x98] sm:$0xf0] }
  0x59   :  { %v2891_v29 = vor.u32 %v3329_v20, %v2890_v18  ;;  %v2714_v1 = vld [vmem:[#allocation5 + $0x288] sm:$0xf]  ;;  %v3285_v2 = vld [vmem:[#allocation5 + $0x294] sm:$0xf0]  ;;  %v3215_v20 = vld [vmem:[#allocation5 + $0x6c] sm:$0xf] }
  0x5a   :  { %1259 = vmatpush.bf16.msra.mxu2 %v2459_v22  ;;  %1278 = vmatpush.bf16.msra.mxu3 %v2587_v27  ;;  %v3361_v22 = vld [vmem:[#allocation5 + $0x4f4] sm:$0xf0]  ;;  %v2523_v27 = vor.u32 %v3237_v15, %v2522_v14  ;;  %v2842_v3 = vld [vmem:[#allocation5 + $0x388] sm:$0xf]  ;;  %v2715_v10 = vor.u32 %v3285_v2, %v2714_v1  ;;  %v2412_v48 = vld [vmem:[#allocation5 + $0x38] sm:$0xf0] }
  0x5b   :  { %1155 = vmatmul.bf16.gmra.mxu0 %v3634_v40  ;;  %1174 = vmatmul.bf16.gmra.mxu1 %v3604_v45  ;;  %v3019_v30 = vor.u32 %v3361_v22, %v3018_v21  ;;  %v3317_v5 = vld [vmem:[#allocation5 + $0x394] sm:$0xf0]  ;;  %v2970_v6 = vld [vmem:[#allocation5 + $0x488] sm:$0xf]  ;;  %v2444_v21 = vld [vmem:[#allocation5 + $0x78] sm:$0xf0] }
  0x5c   :  { %1222 = vmatpush.bf16.msra.mxu0 %v2823_v34  ;;  %1241 = vmatpush.bf16.msra.mxu1 %v2951_v35  ;;  %v2874_v34 = vld [vmem:[#allocation5 + $0x3c8] sm:$0xf]  ;;  %v3325_v35 = vld [vmem:[#allocation5 + $0x3d4] sm:$0xf0]  ;;  %v2843_v11 = vor.u32 %v3317_v5, %v2842_v3  ;;  %v3203_v2 = vld [vmem:[#allocation5 + $0xc] sm:$0xf] }
  0x5d   :  { %1193 = vmatmul.bf16.gmra.mxu2 %v3606_v51  ;;  %1212 = vmatmul.bf16.gmra.mxu3 %v3608_v52  ;;  %v2875_v42 = vor.u32 %v3325_v35, %v2874_v34  ;;  %v2698_v13 = vld [vmem:[#allocation5 + $0x268] sm:$0xf]  ;;  %v3281_v14 = vld [vmem:[#allocation5 + $0x274] sm:$0xf0]  ;;  %v2396_v3 = vld [vmem:[#allocation5 + $0x18] sm:$0xf0] }
  0x5e   :  { %1260 = vmatpush.bf16.msra.mxu2 %v2443_v36  ;;  %1279 = vmatpush.bf16.msra.mxu3 %v2571_v41  ;;  %v3002_v36 = vld [vmem:[#allocation5 + $0x4c8] sm:$0xf]  ;;  %v2747_v41 = vor.u32 %v3293_v33, %v2746_v32  ;;  %v3313_v17 = vld [vmem:[#allocation5 + $0x374] sm:$0xf0]  ;;  %v2699_v22 = vor.u32 %v3281_v14, %v2698_v13  ;;  %v3211_v32 = vld [vmem:[#allocation5 + $0x4c] sm:$0xf] }
  0x5f   :  { %v3003_v43 = vor.u32 %v3357_v37, %v3002_v36  ;;  %v2826_v15 = vld [vmem:[#allocation5 + $0x368] sm:$0xf]  ;;  %v3277_v26 = vld [vmem:[#allocation5 + $0x254] sm:$0xf0]  ;;  %v2428_v33 = vld [vmem:[#allocation5 + $0x58] sm:$0xf0] }
  0x60   :  { %1223 = vmatpush.bf16.msra.mxu0 %v2807_v50  ;;  %1242 = vmatpush.bf16.msra.mxu1 %v2935_v56  ;;  %v2495_v50 = vor.u32 %v3227_v38, %v2492_v39  ;;  %v2986_v56 = vld [vmem:[#allocation5 + $0x4a8] sm:$0xf]  ;;  %v3273_v38 = vld [vmem:[#allocation5 + $0x234] sm:$0xf0]  ;;  %v2636_v5 = vld [vmem:[#allocation5 + $0x1f8] sm:$0xf0] }
  0x61   :  { %v2954_v18 = vld [vmem:[#allocation5 + $0x468] sm:$0xf]  ;;  %v3333_v1 = vld [vmem:[#allocation5 + $0x414] sm:$0xf0]  ;;  %v3359_v13 = vld [vmem:[#allocation5 + $0x4ec] sm:$0xf] }
  0x62   :  { %1261 = vmatpush.bf16.msra.mxu2 %v2427_v59  ;;  %1280 = vmatpush.bf16.msra.mxu3 %v2555_v62  ;;  %v3353_v59 = vld [vmem:[#allocation5 + $0x4b4] sm:$0xf0]  ;;  %v2731_v62 = vor.u32 %v3289_v47, %v2730_v44  ;;  %v2682_v25 = vld [vmem:[#allocation5 + $0x248] sm:$0xf]  ;;  %v3207_v47 = vld [vmem:[#allocation5 + $0x2c] sm:$0xf] }
  0x63   :  { %v2987_v0 = vor.u32 %v3353_v59, %v2986_v56  ;;  %v2683_v34 = vor.u32 %v3277_v26, %v2682_v25  ;;  %v2666_v37 = vld [vmem:[#allocation5 + $0x228] sm:$0xf]  ;;  %v3337_v44 = vld [vmem:[#allocation5 + $0x434] sm:$0xf0]  ;;  %v3020_v14 = vld [vmem:[#allocation5 + $0x4f8] sm:$0xf0] }
  0x64   :  { %1224 = vmatpush.bf16.msra.mxu0 %v2791_v4  ;;  %1243 = vmatpush.bf16.msra.mxu1 %v2919_v7  ;;  %v2479_v4 = vor.u32 %v3223_v60, %v2476_v61  ;;  %v3349_v7 = vld [vmem:[#allocation5 + $0x494] sm:$0xf0]  ;;  %v2794_v39 = vld [vmem:[#allocation5 + $0x328] sm:$0xf]  ;;  %v2876_v25 = vld [vmem:[#allocation5 + $0x3d8] sm:$0xf0] }
  0x65   :  { %v2650_v53 = vld [vmem:[#allocation5 + $0x208] sm:$0xf]  ;;  %v3269_v56 = vld [vmem:[#allocation5 + $0x214] sm:$0xf0]  ;;  %v3355_v26 = vld [vmem:[#allocation5 + $0x4cc] sm:$0xf] }
  0x66   :  { %1262 = vmatpush.bf16.msra.mxu2 %v2411_v8  ;;  %1281 = vmatpush.bf16.msra.mxu3 %v2539_v12  ;;  %v3219_v8 = vld [vmem:[#allocation5 + $0x8c] sm:$0xf]  ;;  %v2971_v12 = vor.u32 %v3349_v7, %v2970_v6  ;;  %v2778_v61 = vld [vmem:[#allocation5 + $0x308] sm:$0xf]  ;;  %v2651_v7 = vor.u32 %v3269_v56, %v2650_v53  ;;  %v2716_v53 = vld [vmem:[#allocation5 + $0x298] sm:$0xf0] }
  0x67   :  { %v2463_v16 = vor.u32 %v3219_v8, %v2460_v9  ;;  %v3295_v6 = vld [vmem:[#allocation5 + $0x2ec] sm:$0xf]  ;;  %v2764_v8 = vld [vmem:[#allocation5 + $0x2f8] sm:$0xf0] }
  0x68   :  { %1225 = vmatpush.bf16.msra.mxu0 %v2775_v19  ;;  %1244 = vmatpush.bf16.msra.mxu1 %v2903_v23  ;;  %v3345_v19 = vld [vmem:[#allocation5 + $0x474] sm:$0xf0]  ;;  %v2827_v23 = vor.u32 %v3313_v17, %v2826_v15  ;;  %v3327_v9 = vld [vmem:[#allocation5 + $0x3ec] sm:$0xf]  ;;  %v2399_v15 = vor.u32 %v3203_v2, %v2396_v3  ;;  %v2767_v17 = vor.u32 %v3295_v6, %v2764_v8  ;;  %v2828_v6 = vld [vmem:[#allocation5 + $0x378] sm:$0xf0] }
  0x69   :  { %v3315_v56 = vld [vmem:[#allocation5 + $0x38c] sm:$0xf]  ;;  %v2956_v8 = vld [vmem:[#allocation5 + $0x478] sm:$0xf0] }
  0x6a   :  { %1263 = vmatpush.bf16.msra.mxu2 %v2395_v24  ;;  %1282 = vmatpush.bf16.msra.mxu3 %v2523_v27  ;;  %v2955_v24 = vor.u32 %v3345_v19, %v2954_v18  ;;  %v2810_v27 = vld [vmem:[#allocation5 + $0x348] sm:$0xf]  ;;  %v3023_v19 = vor.u32 %v3359_v13, %v3020_v14  ;;  %v3279_v2 = vld [vmem:[#allocation5 + $0x26c] sm:$0xf]  ;;  %v2556_v13 = vld [vmem:[#allocation5 + $0x158] sm:$0xf0] }
  0x6b   :  { %1226 = vmatmul.bf16.vlgmr.msra.gmra.mxu0 %v3574_v58  ;;  %1245 = vmatmul.bf16.vlgmr.msra.gmra.mxu1 %v3622_v46  ;;  %v3275_v14 = vld [vmem:[#allocation5 + $0x24c] sm:$0xf] }
  0x6c   :  { %1294 = vmatpush.bf16.msrb.mxu0 %v2763_v28  ;;  %1313 = vmatpush.bf16.msrb.mxu1 %v2891_v29  ;;  %v2447_v28 = vor.u32 %v3215_v20, %v2444_v21  ;;  %v3309_v29 = vld [vmem:[#allocation5 + $0x354] sm:$0xf0]  ;;  %v3259_v20 = vld [vmem:[#allocation5 + $0x1cc] sm:$0xf]  ;;  %v2620_v21 = vld [vmem:[#allocation5 + $0x1d8] sm:$0xf0] }
  0x6d   :  { %1264 = vmatmul.bf16.vlgmr.msra.gmra.mxu2 %v3568_v49  ;;  %1283 = vmatmul.bf16.vlgmr.msra.gmra.mxu3 %v3570_v54  ;;  %v2811_v35 = vor.u32 %v3309_v29, %v2810_v27  ;;  %v3004_v27 = vld [vmem:[#allocation5 + $0x4d8] sm:$0xf0] }
  0x6e   :  { %1332 = vmatpush.bf16.msrb.mxu2 %v3019_v30  ;;  %1351 = vmatpush.bf16.msrb.mxu3 %v2511_v31  ;;  %v2938_v30 = vld [vmem:[#allocation5 + $0x448] sm:$0xf]  ;;  %v3341_v31 = vld [vmem:[#allocation5 + $0x454] sm:$0xf0] }
  0x6f   :  { %v2939_v36 = vor.u32 %v3341_v31, %v2938_v30  ;;  %v3255_v31 = vld [vmem:[#allocation5 + $0x1ac] sm:$0xf] }
  0x70   :  { %1295 = vmatpush.bf16.msrb.mxu0 %v2747_v41  ;;  %1314 = vmatpush.bf16.msrb.mxu1 %v2875_v42  ;;  %v2431_v41 = vor.u32 %v3211_v32, %v2428_v33  ;;  %v3305_v42 = vld [vmem:[#allocation5 + $0x334] sm:$0xf0]  ;;  %v2604_v32 = vld [vmem:[#allocation5 + $0x1b8] sm:$0xf0]  ;;  %v3287_v33 = vld [vmem:[#allocation5 + $0x2ac] sm:$0xf] }
  0x71   :  { %v2795_v59 = vor.u32 %v3305_v42, %v2794_v39  ;;  %v2988_v39 = vld [vmem:[#allocation5 + $0x4b8] sm:$0xf0] }
  0x72   :  { %1333 = vmatpush.bf16.msrb.mxu2 %v3003_v43  ;;  %1352 = vmatpush.bf16.msrb.mxu3 %v2495_v50  ;;  %v2922_v43 = vld [vmem:[#allocation5 + $0x428] sm:$0xf]  ;;  %v2667_v50 = vor.u32 %v3273_v38, %v2666_v37  ;;  %v2860_v37 = vld [vmem:[#allocation5 + $0x3b8] sm:$0xf0]  ;;  %v3351_v38 = vld [vmem:[#allocation5 + $0x4ac] sm:$0xf] }
  0x73   :  { %v2923_v60 = vor.u32 %v3337_v44, %v2922_v43  ;;  %v3251_v44 = vld [vmem:[#allocation5 + $0x18c] sm:$0xf] }
  0x74   :  { %1296 = vmatpush.bf16.msrb.mxu0 %v2731_v62  ;;  %1315 = vmatpush.bf16.msrb.mxu1 %v2859_v63  ;;  %v3301_v62 = vld [vmem:[#allocation5 + $0x314] sm:$0xf0]  ;;  %v2906_v63 = vld [vmem:[#allocation5 + $0x408] sm:$0xf] }
  0x76   :  { %1334 = vmatpush.bf16.msrb.mxu2 %v2987_v0  ;;  %1353 = vmatpush.bf16.msrb.mxu3 %v2479_v4  ;;  %v2415_v0 = vor.u32 %v3207_v47, %v2412_v48  ;;  %v3263_v4 = vld [vmem:[#allocation5 + $0x1ec] sm:$0xf]  ;;  %v2588_v47 = vld [vmem:[#allocation5 + $0x198] sm:$0xf0] }
  0x77   :  { %v3283_v48 = vld [vmem:[#allocation5 + $0x28c] sm:$0xf] }
  0x78   :  { %1297 = vmatpush.bf16.msrb.mxu0 %v2715_v10  ;;  %1316 = vmatpush.bf16.msrb.mxu1 %v2843_v11  ;;  %v2892_v10 = vld [vmem:[#allocation5 + $0x3f8] sm:$0xf0]  ;;  %v2779_v11 = vor.u32 %v3301_v62, %v2778_v61  ;;  %v2591_v62 = vor.u32 %v3251_v44, %v2588_v47  ;;  %v3331_v44 = vld [vmem:[#allocation5 + $0x40c] sm:$0xf] }
  0x79   :  { %v2895_v18 = vor.u32 %v3327_v9, %v2892_v10  ;;  %v2972_v61 = vld [vmem:[#allocation5 + $0x498] sm:$0xf0] }
  0x7a   :  { %1335 = vmatpush.bf16.msrb.mxu2 %v2971_v12  ;;  %1354 = vmatpush.bf16.msrb.mxu3 %v2463_v16  ;;  %v2907_v12 = vor.u32 %v3333_v1, %v2906_v63  ;;  %v2639_v16 = vor.u32 %v3263_v4, %v2636_v5  ;;  %v2572_v1 = vld [vmem:[#allocation5 + $0x178] sm:$0xf0]  ;;  %v3311_v5 = vld [vmem:[#allocation5 + $0x36c] sm:$0xf] }
  0x7b   :  { %1231 = vmatmul.bf16.gmra.mxu0 %v3610_v57  ;;  %1250 = vmatmul.bf16.gmra.mxu1 %v3634_v40  ;;  %v2700_v4 = vld [vmem:[#allocation5 + $0x278] sm:$0xf0] }
  0x7c   :  { %1298 = vmatpush.bf16.msrb.mxu0 %v2699_v22  ;;  %1317 = vmatpush.bf16.msrb.mxu1 %v2827_v23  ;;  %v3291_v22 = vld [vmem:[#allocation5 + $0x2cc] sm:$0xf]  ;;  %v2748_v23 = vld [vmem:[#allocation5 + $0x2d8] sm:$0xf0]  ;;  %v2703_v10 = vor.u32 %v3279_v2, %v2700_v4 }
  0x7d   :  { %1269 = vmatmul.bf16.gmra.mxu2 %v3604_v45  ;;  %1288 = vmatmul.bf16.gmra.mxu3 %v3606_v51  ;;  %v2751_v29 = vor.u32 %v3291_v22, %v2748_v23  ;;  %v2908_v47 = vld [vmem:[#allocation5 + $0x418] sm:$0xf0] }
  0x7e   :  { %1336 = vmatpush.bf16.msrb.mxu2 %v2955_v24  ;;  %1355 = vmatpush.bf16.msrb.mxu3 %v2447_v28  ;;  %v3323_v24 = vld [vmem:[#allocation5 + $0x3cc] sm:$0xf]  ;;  %v2623_v28 = vor.u32 %v3259_v20, %v2620_v21  ;;  %v2940_v20 = vld [vmem:[#allocation5 + $0x458] sm:$0xf0] }
  0x7f   :  { %v2879_v30 = vor.u32 %v3323_v24, %v2876_v25  ;;  %v3239_v24 = vld [vmem:[#allocation5 + $0x12c] sm:$0xf]  ;;  %v2540_v25 = vld [vmem:[#allocation5 + $0x138] sm:$0xf0] }
  0x80   :  { %1299 = vmatpush.bf16.msrb.mxu0 %v2683_v34  ;;  %1318 = vmatpush.bf16.msrb.mxu1 %v2811_v35  ;;  %v3007_v34 = vor.u32 %v3355_v26, %v3004_v27  ;;  %v2732_v35 = vld [vmem:[#allocation5 + $0x2b8] sm:$0xf0]  ;;  %v3271_v26 = vld [vmem:[#allocation5 + $0x22c] sm:$0xf] }
  0x81   :  { %v2735_v42 = vor.u32 %v3287_v33, %v2732_v35  ;;  %v2543_v33 = vor.u32 %v3239_v24, %v2540_v25 }
  0x82   :  { %1337 = vmatpush.bf16.msrb.mxu2 %v2939_v36  ;;  %1356 = vmatpush.bf16.msrb.mxu3 %v2431_v41  ;;  %v3319_v36 = vld [vmem:[#allocation5 + $0x3ac] sm:$0xf]  ;;  %v2607_v41 = vor.u32 %v3255_v31, %v2604_v32  ;;  %v2924_v32 = vld [vmem:[#allocation5 + $0x438] sm:$0xf0] }
  0x83   :  { %v2863_v43 = vor.u32 %v3319_v36, %v2860_v37  ;;  %v3335_v31 = vld [vmem:[#allocation5 + $0x42c] sm:$0xf]  ;;  %v2524_v37 = vld [vmem:[#allocation5 + $0x118] sm:$0xf0] }
  0x84   :  { %1300 = vmatpush.bf16.msrb.mxu0 %v2667_v50  ;;  %1319 = vmatpush.bf16.msrb.mxu1 %v2795_v59  ;;  %v2991_v50 = vor.u32 %v3351_v38, %v2988_v39  ;;  %v2844_v59 = vld [vmem:[#allocation5 + $0x398] sm:$0xf0]  ;;  %v3235_v36 = vld [vmem:[#allocation5 + $0x10c] sm:$0xf]  ;;  %v2927_v39 = vor.u32 %v3335_v31, %v2924_v32 }
  0x85   :  { %v2847_v63 = vor.u32 %v3315_v56, %v2844_v59  ;;  %v3267_v38 = vld [vmem:[#allocation5 + $0x20c] sm:$0xf] }
  0x86   :  { %1338 = vmatpush.bf16.msrb.mxu2 %v2923_v60  ;;  %1357 = vmatpush.bf16.msrb.mxu3 %v2415_v0  ;;  %v3347_v60 = vld [vmem:[#allocation5 + $0x48c] sm:$0xf] }
  0x87   :  { %v3247_v0 = vld [vmem:[#allocation5 + $0x16c] sm:$0xf]  ;;  %v2975_v3 = vor.u32 %v3347_v60, %v2972_v61 }
  0x88   :  { %1301 = vmatpush.bf16.msrb.mxu0 %v2651_v7  ;;  %1320 = vmatpush.bf16.msrb.mxu1 %v2779_v11  ;;  %v3343_v7 = vld [vmem:[#allocation5 + $0x46c] sm:$0xf]  ;;  %v2575_v9 = vor.u32 %v3247_v0, %v2572_v1  ;;  %v2831_v11 = vor.u32 %v3311_v5, %v2828_v6 }
  0x8a   :  { %1339 = vmatpush.bf16.msrb.mxu2 %v2907_v12  ;;  %1358 = vmatpush.bf16.msrb.mxu3 %v2399_v15  ;;  %v3243_v12 = vld [vmem:[#allocation5 + $0x14c] sm:$0xf]  ;;  %v2959_v15 = vor.u32 %v3343_v7, %v2956_v8 }
  0x8b   :  { %1302 = vmatmul.bf16.vlgmr.msrb.gmra.mxu0 %v3572_v55  ;;  %1321 = vmatmul.bf16.vlgmr.msrb.gmra.mxu1 %v3574_v58  ;;  %v2559_v21 = vor.u32 %v3243_v12, %v2556_v13 }
  0x8c   :  { %1370 = vmatpush.bf16.msra.mxu0 %v2639_v16  ;;  %1389 = vmatpush.bf16.msra.mxu1 %v2767_v17  ;;  %v2684_v16 = vld [vmem:[#allocation5 + $0x258] sm:$0xf0]  ;;  %v3307_v17 = vld [vmem:[#allocation5 + $0x34c] sm:$0xf] }
  0x8d   :  { %1340 = vmatmul.bf16.vlgmr.msrb.gmra.mxu2 %v3622_v46  ;;  %1359 = vmatmul.bf16.vlgmr.msrb.gmra.mxu3 %v3568_v49  ;;  %v2719_v49 = vor.u32 %v3283_v48, %v2716_v53  ;;  %v2687_v22 = vor.u32 %v3275_v14, %v2684_v16  ;;  %v2527_v48 = vor.u32 %v3235_v36, %v2524_v37 }
  0x8e   :  { %1408 = vmatpush.bf16.msra.mxu2 %v2895_v18  ;;  %1427 = vmatpush.bf16.msra.mxu3 %v3023_v19  ;;  %v2812_v18 = vld [vmem:[#allocation5 + $0x358] sm:$0xf0]  ;;  %v3339_v19 = vld [vmem:[#allocation5 + $0x44c] sm:$0xf]  ;;  %v2911_v53 = vor.u32 %v3331_v44, %v2908_v47 }
  0x8f   :  { %v2815_v23 = vor.u32 %v3307_v17, %v2812_v18  ;;  %v2943_v27 = vor.u32 %v3339_v19, %v2940_v20 }
  0x90   :  { %1371 = vmatpush.bf16.msra.mxu0 %v2623_v28  ;;  %1390 = vmatpush.bf16.msra.mxu1 %v2751_v29  ;;  %v2668_v28 = vld [vmem:[#allocation5 + $0x238] sm:$0xf0]  ;;  %v3303_v29 = vld [vmem:[#allocation5 + $0x32c] sm:$0xf] }
  0x92   :  { %1409 = vmatpush.bf16.msra.mxu2 %v2879_v30  ;;  %1428 = vmatpush.bf16.msra.mxu3 %v3007_v34  ;;  %v2796_v30 = vld [vmem:[#allocation5 + $0x338] sm:$0xf0]  ;;  %v2671_v34 = vor.u32 %v3271_v26, %v2668_v28 }
  0x93   :  { %v2799_v35 = vor.u32 %v3303_v29, %v2796_v30 }
  0x94   :  { %1372 = vmatpush.bf16.msra.mxu0 %v2607_v41  ;;  %1391 = vmatpush.bf16.msra.mxu1 %v2735_v42  ;;  %v2652_v41 = vld [vmem:[#allocation5 + $0x218] sm:$0xf0]  ;;  %v3299_v42 = vld [vmem:[#allocation5 + $0x30c] sm:$0xf] }
  0x96   :  { %1410 = vmatpush.bf16.msra.mxu2 %v2863_v43  ;;  %1429 = vmatpush.bf16.msra.mxu3 %v2991_v50  ;;  %v2780_v43 = vld [vmem:[#allocation5 + $0x318] sm:$0xf0] }
  0x97   :  { %v2783_v50 = vor.u32 %v3299_v42, %v2780_v43 }
  0x98   :  { %1373 = vmatpush.bf16.msra.mxu0 %v2591_v62  ;;  %1392 = vmatpush.bf16.msra.mxu1 %v2719_v49 }
  0x9a   :  { %1411 = vmatpush.bf16.msra.mxu2 %v2847_v63  ;;  %1430 = vmatpush.bf16.msra.mxu3 %v2975_v3 }
  0x9b   :  { %1307 = vmatmul.bf16.gmra.mxu0 %v3608_v52  ;;  %1326 = vmatmul.bf16.gmra.mxu1 %v3610_v57 }
  0x9c   :  { %1374 = vmatpush.bf16.msra.mxu0 %v2575_v9  ;;  %1393 = vmatpush.bf16.msra.mxu1 %v2703_v10 }
  0x9d   :  { %1345 = vmatmul.bf16.gmra.mxu2 %v3634_v40  ;;  %1364 = vmatmul.bf16.gmra.mxu3 %v3604_v45  ;;  %v2655_v45 = vor.u32 %v3267_v38, %v2652_v41 }
  0x9e   :  { %1412 = vmatpush.bf16.msra.mxu2 %v2831_v11  ;;  %1431 = vmatpush.bf16.msra.mxu3 %v2959_v15 }
  0xa0   :  { %1375 = vmatpush.bf16.msra.mxu0 %v2559_v21  ;;  %1394 = vmatpush.bf16.msra.mxu1 %v2687_v22 }
  0xa2   :  { %1413 = vmatpush.bf16.msra.mxu2 %v2815_v23  ;;  %1432 = vmatpush.bf16.msra.mxu3 %v2943_v27 }
  0xa4   :  { %1376 = vmatpush.bf16.msra.mxu0 %v2543_v33  ;;  %1395 = vmatpush.bf16.msra.mxu1 %v2671_v34 }
  0xa6   :  { %1414 = vmatpush.bf16.msra.mxu2 %v2799_v35  ;;  %1433 = vmatpush.bf16.msra.mxu3 %v2927_v39 }
  0xa8   :  { %1377 = vmatpush.bf16.msra.mxu0 %v2527_v48  ;;  %1396 = vmatpush.bf16.msra.mxu1 %v2655_v45  ;;  %v1075_v56 = vpop.f32.mrf.mxu0  ;;  %v1094_v59 = vpop.f32.mrf.mxu1 }
  0xa9   :  { %v1095_v3 = vadd.f32 %v1094_v59, %v1075_v56 }
  0xaa   :  { %1415 = vmatpush.bf16.msra.mxu2 %v2783_v50  ;;  %1434 = vmatpush.bf16.msra.mxu3 %v2911_v53 }
  0xab   :  { %1378 = vmatmul.bf16.vlgmr.msra.gmra.mxu0 %v3570_v54  ;;  %1397 = vmatmul.bf16.vlgmr.msra.gmra.mxu1 %v3572_v55 }
  0xad   :  { %1416 = vmatmul.bf16.vlgmr.msra.gmra.mxu2 %v3574_v58  ;;  %1435 = vmatmul.bf16.vlgmr.msra.gmra.mxu3 %v3622_v46 }
  0xb0   :  { %v1113_v60 = vpop.f32.mrf.mxu2  ;;  %v1132_v61 = vpop.f32.mrf.mxu3 }
  0xb1   :  { %v1077_v62 = vpop.f32.mrf.mxu0  ;;  %v1096_v49 = vpop.f32.mrf.mxu1  ;;  %v1114_v7 = vadd.f32 %v1113_v60, %v1095_v3 }
  0xb2   :  { %v1097_v8 = vadd.f32 %v1096_v49, %v1077_v62 }
  0xb3   :  { %v1133_v11 = vadd.f32 %v1132_v61, %v1114_v7 }
  0xb8   :  { %v1115_v63 = vpop.f32.mrf.mxu2  ;;  %v1134_v0 = vpop.f32.mrf.mxu3 }
  0xb9   :  { %v1080_v1 = vpop.f32.mrf.mxu0  ;;  %v1099_v2 = vpop.f32.mrf.mxu1  ;;  %v1116_v10 = vadd.f32 %v1115_v63, %v1097_v8 }
  0xba   :  { %v1100_v18 = vadd.f32 %v1099_v2, %v1080_v1 }
  0xbb   :  { %1383 = vmatmul.bf16.gmra.mxu0 %v3606_v51  ;;  %1402 = vmatmul.bf16.gmra.mxu1 %v3608_v52  ;;  %v1135_v51 = vadd.f32 %v1134_v0, %v1116_v10 }
  0xbd   :  { %1421 = vmatmul.bf16.gmra.mxu2 %v3610_v57  ;;  %1440 = vmatmul.bf16.gmra.mxu3 %v3634_v40 }
  0xc0   :  { %v1118_v54 = vpop.f32.mrf.mxu2  ;;  %v1137_v55 = vpop.f32.mrf.mxu3 }
  0xc1   :  { %v1082_v58 = vpop.f32.mrf.mxu0  ;;  %v1101_v46 = vpop.f32.mrf.mxu1  ;;  %v1119_v22 = vadd.f32 %v1118_v54, %v1100_v18 }
  0xc2   :  { %v1102_v23 = vadd.f32 %v1101_v46, %v1082_v58 }
  0xc3   :  { %v1138_v26 = vadd.f32 %v1137_v55, %v1119_v22 }
  0xc8   :  { %v1120_v4 = vpop.f32.mrf.mxu2  ;;  %v1139_v5 = vpop.f32.mrf.mxu3 }
  0xc9   :  { %v1151_v6 = vpop.f32.mrf.mxu0  ;;  %v1170_v9 = vpop.f32.mrf.mxu1  ;;  %v1121_v25 = vadd.f32 %v1120_v4, %v1102_v23 }
  0xca   :  { %v1152_v12 = vadd.f32 %v1151_v6, %v1133_v11 }
  0xcb   :  { %v1140_v27 = vadd.f32 %v1139_v5, %v1121_v25 }
  0xcc   :  { %v1446_v15 = vmax.f32 %v1152_v12, 0.0 }
  0xd0   :  { %v1189_v52 = vpop.f32.mrf.mxu2  ;;  %v1208_v13 = vpop.f32.mrf.mxu3 }
  0xd1   :  { %v1153_v57 = vpop.f32.mrf.mxu0  ;;  %v1172_v40 = vpop.f32.mrf.mxu1  ;;  %v1190_v37 = vadd.f32 %v1189_v52, %v1170_v9 }
  0xd2   :  { %v1154_v14 = vadd.f32 %v1153_v57, %v1135_v51 }
  0xd3   :  { %v1209_v43 = vadd.f32 %v1208_v13, %v1190_v37 }
  0xd4   :  { %v1450_v16 = vmax.f32 %v1154_v14, 0.0 }
  0xd6   :  { %v3405_v17 = vpack.c.bf16 %v1450_v16, %v1446_v15 }
  0xd8   :  { %3406 = vst [vmem:[#allocation2 + $0x30] sm:$0xff] %v3405_v17   ;;  %v1191_v19 = vpop.f32.mrf.mxu2  ;;  %v1210_v20 = vpop.f32.mrf.mxu3 }
  0xd9   :  { %v1156_v21 = vpop.f32.mrf.mxu0  ;;  %v1175_v24 = vpop.f32.mrf.mxu1  ;;  %v1192_v44 = vadd.f32 %v1191_v19, %v1172_v40 }
  0xda   :  { %v1157_v28 = vadd.f32 %v1156_v21, %v1138_v26 }
  0xdb   :  { %v1211_v48 = vadd.f32 %v1210_v20, %v1192_v44 }
  0xdc   :  { %v1454_v34 = vmax.f32 %v1157_v28, 0.0 }
  0xe0   :  { %v1194_v29 = vpop.f32.mrf.mxu2  ;;  %v1213_v30 = vpop.f32.mrf.mxu3 }
  0xe1   :  { %v1158_v31 = vpop.f32.mrf.mxu0  ;;  %v1177_v33 = vpop.f32.mrf.mxu1  ;;  %v1195_v63 = vadd.f32 %v1194_v29, %v1175_v24 }
  0xe2   :  { %v1159_v32 = vadd.f32 %v1158_v31, %v1140_v27 }
  0xe3   :  { %v1214_v58 = vadd.f32 %v1213_v30, %v1195_v63 }
  0xe4   :  { %v1458_v35 = vmax.f32 %v1159_v32, 0.0 }
  0xe6   :  { %v3410_v36 = vpack.c.bf16 %v1458_v35, %v1454_v34 }
  0xe8   :  { %3442 = vst [vmem:[#allocation2] sm:$0xff] %v3410_v36   ;;  %v1196_v38 = vpop.f32.mrf.mxu2  ;;  %v1215_v39 = vpop.f32.mrf.mxu3 }
  0xe9   :  { %v1227_v41 = vpop.f32.mrf.mxu0  ;;  %v1246_v42 = vpop.f32.mrf.mxu1  ;;  %v1197_v46 = vadd.f32 %v1196_v38, %v1177_v33 }
  0xea   :  { %v1228_v47 = vadd.f32 %v1227_v41, %v1209_v43 }
  0xeb   :  { %v1216_v4 = vadd.f32 %v1215_v39, %v1197_v46  ;;  %v1971_v46 = vld [vmem:[%s3829_s3 + $0x30] sm:$0xff] }
  0xec   :  { %v1247_v56 = vadd.f32 %v1246_v42, %v1228_v47 }
  0xee   :  { %v1447_v62 = vmax.f32 %v1247_v56, 0.0 }
  0xf0   :  { %v1265_v45 = vpop.f32.mrf.mxu2  ;;  %v1284_v50 = vpop.f32.mrf.mxu3 }
  0xf1   :  { %v1229_v53 = vpop.f32.mrf.mxu0  ;;  %v1248_v60 = vpop.f32.mrf.mxu1  ;;  %v1285_v15 = vadd.f32 %v1284_v50, %v1265_v45 }
  0xf2   :  { %v1230_v59 = vadd.f32 %v1229_v53, %v1211_v48 }
  0xf4   :  { %v1249_v61 = vadd.f32 %v1248_v60, %v1230_v59 }
  0xf6   :  { %v1451_v49 = vmax.f32 %v1249_v61, 0.0 }
  0xf8   :  { %v3415_v0 = vpack.c.bf16 %v1451_v49, %v1447_v62  ;;  %v1267_v1 = vpop.f32.mrf.mxu2  ;;  %v1286_v2 = vpop.f32.mrf.mxu3 }
  0xf9   :  { %v1232_v54 = vpop.f32.mrf.mxu0  ;;  %v1251_v55 = vpop.f32.mrf.mxu1  ;;  %v1287_v17 = vadd.f32 %v1286_v2, %v1267_v1 }
  0xfa   :  { %3443 = vst [vmem:[#allocation2 + $0x18] sm:$0xff] %v3415_v0   ;;  %v1233_v3 = vadd.f32 %v1232_v54, %v1214_v58  ;;  %v3502_v58 = vmov 0  }
  0xfb   :  { %3454 = vset.pattern.permute.xlu1 %v3502_v58  ;;  %3453 = vset.pattern.permute.xlu0 %v3502_v58 }
  0xfc   :  { %v1252_v8 = vadd.f32 %v1251_v55, %v1233_v3  ;;  %2005 = vperm.xlu0 %3453, %v1971_v46   ;;  %1872 = vperm.xlu1 %3454, %v1971_v46  }
  0xfd   :  { %3455 = vset.pattern.permute.xlu2 %v3502_v58  ;;  %v3373_v58 = vld [vmem:[%s3828_s2 + $0x18] sm:$0xff] }
  0xfe   :  { %v1455_v51 = vmax.f32 %v1252_v8, 0.0 }
 0x100   :  { %v1270_v5 = vpop.f32.mrf.mxu2  ;;  %v1289_v6 = vpop.f32.mrf.mxu3 }
 0x101   :  { %v1234_v7 = vpop.f32.mrf.mxu0  ;;  %v1253_v10 = vpop.f32.mrf.mxu1  ;;  %v1290_v34 = vadd.f32 %v1289_v6, %v1270_v5 }
 0x102   :  { %v1235_v9 = vadd.f32 %v1234_v7, %v1216_v4 }
 0x104   :  { %v1254_v11 = vadd.f32 %v1253_v10, %v1235_v9 }
 0x106   :  { %v1459_v12 = vmax.f32 %v1254_v11, 0.0 }
 0x108   :  { %v3420_v52 = vpack.c.bf16 %v1459_v12, %v1455_v51  ;;  %v1272_v13 = vpop.f32.mrf.mxu2  ;;  %v1291_v57 = vpop.f32.mrf.mxu3  ;;  %v1972_v12 = vld [vmem:[%s3829_s3 + $0x38] sm:$0xff] }
 0x109   :  { %v1303_v14 = vpop.f32.mrf.mxu0  ;;  %v1322_v40 = vpop.f32.mrf.mxu1  ;;  %v1292_v36 = vadd.f32 %v1291_v57, %v1272_v13  ;;  %2010 = vperm.xlu0 %3453, %v1972_v12   ;;  %1877 = vperm.xlu1 %3454, %v1972_v12  }
 0x10a   :  { %3444 = vst [vmem:[#allocation2 + $0x10] sm:$0xff] %v3420_v52   ;;  %v1304_v18 = vadd.f32 %v1303_v14, %v1285_v15 }
 0x10c   :  { %v1323_v23 = vadd.f32 %v1322_v40, %v1304_v18 }
 0x110   :  { %v1341_v16 = vpop.f32.mrf.mxu2  ;;  %v1360_v19 = vpop.f32.mrf.mxu3 }
 0x111   :  { %v1305_v20 = vpop.f32.mrf.mxu0  ;;  %v1324_v21 = vpop.f32.mrf.mxu1  ;;  %v1342_v24 = vadd.f32 %v1341_v16, %v1323_v23  ;;  %1744 = vperm.xlu1 %3454, %v1972_v12   ;;  %1739 = vperm.xlu0 %3453, %v1971_v46  }
 0x112   :  { %v1306_v22 = vadd.f32 %v1305_v20, %v1287_v17 }
 0x113   :  { %v1448_v31 = vmax.f32 %v1342_v24, 0.0 }
 0x114   :  { %v1325_v25 = vadd.f32 %v1324_v21, %v1306_v22 }
 0x118   :  { %v1343_v26 = vpop.f32.mrf.mxu2  ;;  %v1362_v28 = vpop.f32.mrf.mxu3 }
 0x119   :  { %v1344_v27 = vadd.f32 %v1343_v26, %v1325_v25  ;;  %v1308_v29 = vpop.f32.mrf.mxu0  ;;  %v1327_v30 = vpop.f32.mrf.mxu1  ;;  %1558 = vperm.xlu1 %3454, %v1971_v46   ;;  %v3377_v46 = vld [vmem:[%s3828_s2 + $0x38] sm:$0xff] }
 0x11a   :  { %v1309_v37 = vadd.f32 %v1308_v29, %v1290_v34  ;;  %v1969_v29 = vld [vmem:[%s3829_s3 + $0x20] sm:$0xff] }
 0x11b   :  { %v1452_v32 = vmax.f32 %v1344_v27, 0.0  ;;  %v1837_v27 = vld [vmem:[%s3829_s3 + $0x28] sm:$0xff]  ;;  %1995 = vperm.xlu2 %3455, %v1969_v29  }
 0x11c   :  { %v1328_v43 = vadd.f32 %v1327_v30, %v1309_v37  ;;  %1867 = vperm.xlu0 %3453, %v1837_v27   ;;  %v3679_v30 = vld [vmem:[%s3829_s3 + $0x10] sm:$0xff]  ;;  %v1832_v37 = vld [vmem:[%s3829_s3] sm:$0xff] }
 0x11d   :  { %v3425_v33 = vpack.c.bf16 %v1452_v32, %v1448_v31  ;;  %v1968_v31 = vld [vmem:[%s3829_s3 + $0x18] sm:$0xff] }
 0x11f   :  { %3445 = vst [vmem:[#allocation2 + $0x8] sm:$0xff] %v3425_v33  }
 0x120   :  { %v1346_v35 = vpop.f32.mrf.mxu2  ;;  %v1365_v38 = vpop.f32.mrf.mxu3 }
 0x121   :  { %v1310_v39 = vpop.f32.mrf.mxu0  ;;  %v1329_v41 = vpop.f32.mrf.mxu1  ;;  %v1347_v44 = vadd.f32 %v1346_v35, %v1328_v43  ;;  %1990 = vperm.xlu1 %3454, %v1968_v31   ;;  %v1966_v35 = vld [vmem:[%s3829_s3 + $0x8] sm:$0xff]  ;;  %v3370_v43 = vld [vmem:[%s3828_s2] sm:$0xff] }
 0x122   :  { %v1311_v42 = vadd.f32 %v1310_v39, %v1292_v36  ;;  %v3364_v39 = vld [vmem:[#allocation2 + $0x18] sm:$0xff] }
 0x123   :  { %v1456_v59 = vmax.f32 %v1347_v44, 0.0  ;;  %2000 = vperm.xlu2 %3455, %v1837_v27   ;;  %v3374_v44 = vld [vmem:[%s3828_s2 + $0x20] sm:$0xff] }
 0x124   :  { %v1330_v47 = vadd.f32 %v1329_v41, %v1311_v42  ;;  %1985 = vperm.xlu0 %3453, %v3679_v30   ;;  %v3363_v41 = vld [vmem:[#allocation2] sm:$0xff]  ;;  %v3362_v42 = vld [vmem:[#allocation2 + $0x30] sm:$0xff] }
 0x126   :  { %v3366_v36 = vld [vmem:[#allocation2 + $0x8] sm:$0xff] }
 0x128   :  { %v1348_v48 = vpop.f32.mrf.mxu2  ;;  %v1367_v50 = vpop.f32.mrf.mxu3 }
 0x129   :  { %v1349_v45 = vadd.f32 %v1348_v48, %v1330_v47  ;;  %v1379_v53 = vpop.f32.mrf.mxu0  ;;  %v1398_v56 = vpop.f32.mrf.mxu1  ;;  %1852 = vperm.xlu1 %3454, %v3679_v30   ;;  %v3378_v47 = vld [vmem:[%s3828_s2 + $0x40] sm:$0xff] }
 0x12a   :  { %v1380_v62 = vadd.f32 %v1379_v53, %v1360_v19  ;;  %v3382_v48 = vld [vmem:[%s3828_s2 + $0x60] sm:$0xff]  ;;  %v3375_v53 = vld [vmem:[%s3828_s2 + $0x28] sm:$0xff] }
 0x12b   :  { %v1460_v60 = vmax.f32 %v1349_v45, 0.0  ;;  %1862 = vperm.xlu2 %3455, %v1969_v29   ;;  %v3456_v45 = vld [vmem:[#allocation4] ss:$0 sm:$0xff] }
 0x12c   :  { %v1399_v2 = vadd.f32 %v1398_v56, %v1380_v62  ;;  %1734 = vperm.xlu0 %3453, %v1837_v27   ;;  %v3379_v56 = vld [vmem:[%s3828_s2 + $0x48] sm:$0xff]  ;;  %v3376_v62 = vld [vmem:[%s3828_s2 + $0x30] sm:$0xff] }
 0x12d   :  { %v3430_v61 = vpack.c.bf16 %v1460_v60, %v1456_v59  ;;  %v3383_v59 = vld [vmem:[%s3828_s2 + $0x68] sm:$0xff] }
 0x12f   :  { %3446 = vst [vmem:[#allocation2 + $0x20] sm:$0xff] %v3430_v61   ;;  %v3372_v61 = vld [vmem:[%s3828_s2 + $0x10] sm:$0xff] }
 0x130   :  { %v1417_v49 = vpop.f32.mrf.mxu2  ;;  %v1436_v63 = vpop.f32.mrf.mxu3 }
 0x131   :  { %v1381_v0 = vpop.f32.mrf.mxu0  ;;  %v1400_v1 = vpop.f32.mrf.mxu1  ;;  %v1418_v55 = vadd.f32 %v1417_v49, %v1399_v2  ;;  %1553 = vperm.xlu1 %3454, %v1837_v27   ;;  %v3380_v49 = vld [vmem:[%s3828_s2 + $0x50] sm:$0xff] }
 0x132   :  { %v1382_v54 = vadd.f32 %v1381_v0, %v1362_v28 }
 0x133   :  { %v1437_v5 = vadd.f32 %v1436_v63, %v1418_v55  ;;  %1563 = vperm.xlu2 %3455, %v1972_v12   ;;  %v3384_v63 = vld [vmem:[%s3828_s2 + $0x70] sm:$0xff] }
 0x134   :  { %v1401_v3 = vadd.f32 %v1400_v1, %v1382_v54  ;;  %1548 = vperm.xlu0 %3453, %v1969_v29  }
 0x135   :  { %v1449_v11 = vmax.f32 %v1437_v5, 0.0 }
 0x136   :  { %v3367_v34 = vld [vmem:[#allocation2 + $0x20] sm:$0xff] }
 0x138   :  { %v1419_v4 = vpop.f32.mrf.mxu2  ;;  %v1438_v7 = vpop.f32.mrf.mxu3 }
 0x139   :  { %v1420_v6 = vadd.f32 %v1419_v4, %v1401_v3  ;;  %v1384_v8 = vpop.f32.mrf.mxu0  ;;  %v1403_v10 = vpop.f32.mrf.mxu1  ;;  %1719 = vperm.xlu1 %3454, %v3679_v30   ;;  %v3381_v3 = vld [vmem:[%s3828_s2 + $0x58] sm:$0xff] }
 0x13a   :  { %v1385_v13 = vadd.f32 %v1384_v8, %v1365_v38  ;;  %v3365_v38 = vld [vmem:[#allocation2 + $0x10] sm:$0xff]  ;;  %v3385_v4 = vld [vmem:[%s3828_s2 + $0x78] sm:$0xff] }
 0x13b   :  { %v1439_v9 = vadd.f32 %v1438_v7, %v1420_v6  ;;  %1729 = vperm.xlu2 %3455, %v1969_v29  }
 0x13c   :  { %v1404_v15 = vadd.f32 %v1403_v10, %v1385_v13  ;;  %1980 = vperm.xlu0 %3453, %v1966_v35  }
 0x13d   :  { %v1453_v51 = vmax.f32 %v1439_v9, 0.0 }
 0x13f   :  { %v3435_v52 = vpack.c.bf16 %v1453_v51, %v1449_v11 }
 0x140   :  { %v1422_v57 = vpop.f32.mrf.mxu2  ;;  %v1441_v14 = vpop.f32.mrf.mxu3 }
 0x141   :  { %3447 = vst [vmem:[#allocation2 + $0x28] sm:$0xff] %v3435_v52   ;;  %v1386_v40 = vpop.f32.mrf.mxu0  ;;  %v1423_v17 = vadd.f32 %v1422_v57, %v1404_v15  ;;  %v1405_v18 = vpop.f32.mrf.mxu1  ;;  %1847 = vperm.xlu1 %3454, %v1966_v35  }
 0x142   :  { %v1387_v16 = vadd.f32 %v1386_v40, %v1367_v50  ;;  %v3371_v50 = vld [vmem:[%s3828_s2 + $0x8] sm:$0xff] }
 0x143   :  { %v1442_v21 = vadd.f32 %v1441_v14, %v1423_v17  ;;  %1857 = vperm.xlu2 %3455, %v1968_v31  }
 0x144   :  { %v1406_v19 = vadd.f32 %v1405_v18, %v1387_v16  ;;  %1842 = vperm.xlu0 %3453, %v1832_v37  }
 0x145   :  { %v1457_v25 = vmax.f32 %v1442_v21, 0.0 }
 0x148   :  { %v1424_v20 = vpop.f32.mrf.mxu2  ;;  %v1443_v23 = vpop.f32.mrf.mxu3  ;;  %v3368_v33 = vld [vmem:[#allocation2 + $0x28] sm:$0xff] }
 0x149   :  { %v1425_v22 = vadd.f32 %v1424_v20, %v1406_v19  ;;  %1709 = vperm.xlu1 %3454, %v1832_v37  }
 0x14b   :  { %v1444_v24 = vadd.f32 %v1443_v23, %v1425_v22  ;;  %1975 = vperm.xlu2 %3455, %v1832_v37  }
 0x14c   :  { %1543 = vperm.xlu0 %3453, %v1968_v31  }
 0x14d   :  { %v1461_v26 = vmax.f32 %v1444_v24, 0.0 }
 0x14f   :  { %v3440_v28 = vpack.c.bf16 %v1461_v26, %v1457_v25 }
 0x151   :  { %3448 = vst [vmem:[#allocation2 + $0x38] sm:$0xff] %v3440_v28   ;;  %1533 = vperm.xlu1 %3454, %v1966_v35  }
 0x153   :  { %1724 = vperm.xlu2 %3455, %v1968_v31  }
 0x154   :  { %1528 = vperm.xlu0 %3453, %v1832_v37  }
 0x158   :  { %v3369_v32 = vld [vmem:[#allocation2 + $0x38] sm:$0xff] }
 0x159   :  { %1638 = vmatpush.bf16.xpose.msrb.mxu0 %v3369_v32  ;;  %1771 = vmatpush.bf16.xpose.msrb.mxu1 %v3369_v32 }
 0x15a   :  { %1904 = vmatpush.bf16.xpose.msrb.mxu2 %v3369_v32  ;;  %2037 = vmatpush.bf16.xpose.msrb.mxu3 %v3369_v32 }
 0x15b   :  { %1538 = vperm.xlu2 %3455, %v3679_v30  }
 0x161   :  { %1639 = vmatpush.bf16.xpose.msrb.mxu0 %v3368_v33  ;;  %1772 = vmatpush.bf16.xpose.msrb.mxu1 %v3368_v33 }
 0x162   :  { %1905 = vmatpush.bf16.xpose.msrb.mxu2 %v3368_v33  ;;  %2038 = vmatpush.bf16.xpose.msrb.mxu3 %v3368_v33 }
 0x163   :  { %1714 = vperm.xlu2 %3455, %v1966_v35  }
 0x169   :  { %1640 = vmatpush.bf16.xpose.msrb.mxu0 %v3367_v34  ;;  %1773 = vmatpush.bf16.xpose.msrb.mxu1 %v3367_v34 }
 0x16a   :  { %1906 = vmatpush.bf16.xpose.msrb.mxu2 %v3367_v34  ;;  %2039 = vmatpush.bf16.xpose.msrb.mxu3 %v3367_v34 }
 0x16b   :  { %2111 = vperm.xlu2 %3455, %v3456_v45  }
 0x16e   :  { %v3718_v60 = vpop.permute.xlu0 %2005  ;;  %v3732_v0 = vpop.permute.xlu1 %1872 }
 0x171   :  { %1641 = vmatpush.bf16.xpose.msrb.mxu0 %v3366_v36  ;;  %1774 = vmatpush.bf16.xpose.msrb.mxu1 %v3366_v36 }
 0x172   :  { %1907 = vmatpush.bf16.xpose.msrb.mxu2 %v3366_v36  ;;  %2040 = vmatpush.bf16.xpose.msrb.mxu3 %v3366_v36 }
 0x175   :  { %v3736_v2 = vpop.permute.xlu2 %1995 }
 0x179   :  { %1642 = vmatpush.bf16.xpose.msrb.mxu0 %v3365_v38  ;;  %1775 = vmatpush.bf16.xpose.msrb.mxu1 %v3365_v38 }
 0x17a   :  { %1908 = vmatpush.bf16.xpose.msrb.mxu2 %v3365_v38  ;;  %2041 = vmatpush.bf16.xpose.msrb.mxu3 %v3365_v38 }
 0x17b   :  { %v3734_v1 = vpop.permute.xlu0 %2010  ;;  %v3738_v54 = vpop.permute.xlu1 %1877 }
 0x17d   :  { %v3754_v5 = vpop.permute.xlu2 %2000 }
 0x181   :  { %1643 = vmatpush.bf16.xpose.msrb.mxu0 %v3364_v39  ;;  %1776 = vmatpush.bf16.xpose.msrb.mxu1 %v3364_v39 }
 0x182   :  { %1909 = vmatpush.bf16.xpose.msrb.mxu2 %v3364_v39  ;;  %2042 = vmatpush.bf16.xpose.msrb.mxu3 %v3364_v39 }
 0x183   :  { %v3740_v55 = vpop.permute.xlu0 %1739  ;;  %v3756_v6 = vpop.permute.xlu1 %1744 }
 0x185   :  { %v3760_v8 = vpop.permute.xlu2 %1862 }
 0x189   :  { %1644 = vmatpush.bf16.xpose.msrb.mxu0 %v3363_v41  ;;  %1777 = vmatpush.bf16.xpose.msrb.mxu1 %v3363_v41 }
 0x18a   :  { %1910 = vmatpush.bf16.xpose.msrb.mxu2 %v3363_v41  ;;  %2043 = vmatpush.bf16.xpose.msrb.mxu3 %v3363_v41 }
 0x18b   :  { %v3762_v9 = vpop.permute.xlu1 %1558 }
 0x18d   :  { %v3766_v11 = vpop.permute.xlu2 %1563 }
 0x18e   :  { %v3758_v7 = vpop.permute.xlu0 %1867 }
 0x191   :  { %1645 = vmatpush.bf16.xpose.msrb.mxu0 %v3362_v42  ;;  %1778 = vmatpush.bf16.xpose.msrb.mxu1 %v3362_v42 }
 0x192   :  { %1911 = vmatpush.bf16.xpose.msrb.mxu2 %v3362_v42  ;;  %2044 = vmatpush.bf16.xpose.msrb.mxu3 %v3362_v42 }
 0x193   :  { %v3768_v51 = vpop.permute.xlu1 %1990 }
 0x195   :  { %v3772_v52 = vpop.permute.xlu2 %1729 }
 0x196   :  { %v3764_v10 = vpop.permute.xlu0 %1985 }
 0x198   :  { %1646 = vmatmul.bf16.vlgmr.msrb.gmra.mxu0 %v3370_v43  ;;  %1779 = vmatmul.bf16.vlgmr.msrb.gmra.mxu1 %v3374_v44 }
 0x199   :  { %1912 = vmatmul.bf16.vlgmr.msrb.gmra.mxu2 %v3378_v47  ;;  %2045 = vmatmul.bf16.vlgmr.msrb.gmra.mxu3 %v3382_v48 }
 0x19b   :  { %v3774_v13 = vpop.permute.xlu1 %1852 }
 0x19d   :  { %v3778_v14 = vpop.permute.xlu2 %1857 }
 0x19e   :  { %v3770_v12 = vpop.permute.xlu0 %1734 }
 0x1a3   :  { %v3780_v40 = vpop.permute.xlu1 %1553 }
 0x1a5   :  { %v1976_v16 = vpop.permute.xlu2 %1975 }
 0x1a6   :  { %v3776_v57 = vpop.permute.xlu0 %1548 }
 0x1a8   :  { %1651 = vmatmul.bf16.gmra.mxu0 %v3371_v50  ;;  %1784 = vmatmul.bf16.gmra.mxu1 %v3375_v53 }
 0x1a9   :  { %1917 = vmatmul.bf16.gmra.mxu2 %v3379_v56  ;;  %2050 = vmatmul.bf16.gmra.mxu3 %v3383_v59 }
 0x1ab   :  { %v1720_v17 = vpop.permute.xlu1 %1719 }
 0x1ad   :  { %v3782_v19 = vpop.permute.xlu2 %1724 }
 0x1ae   :  { %v1981_v15 = vpop.permute.xlu0 %1980 }
 0x1b3   :  { %v1848_v20 = vpop.permute.xlu1 %1847 }
 0x1b5   :  { %v1539_v22 = vpop.permute.xlu2 %1538 }
 0x1b6   :  { %v1843_v18 = vpop.permute.xlu0 %1842 }
 0x1b8   :  { %1656 = vmatmul.bf16.gmra.mxu0 %v3372_v61  ;;  %1789 = vmatmul.bf16.gmra.mxu1 %v3376_v62 }
 0x1b9   :  { %1922 = vmatmul.bf16.gmra.mxu2 %v3380_v49  ;;  %2055 = vmatmul.bf16.gmra.mxu3 %v3384_v63 }
 0x1bb   :  { %v1710_v23 = vpop.permute.xlu1 %1709 }
 0x1bd   :  { %v1715_v33 = vpop.permute.xlu2 %1714 }
 0x1be   :  { %v1544_v21 = vpop.permute.xlu0 %1543 }
 0x1c3   :  { %v1534_v34 = vpop.permute.xlu1 %1533 }
 0x1c6   :  { %v1529_v24 = vpop.permute.xlu0 %1528 }
 0x1c8   :  { %1661 = vmatmul.bf16.gmra.mxu0 %v3373_v58  ;;  %1794 = vmatmul.bf16.gmra.mxu1 %v3377_v46 }
 0x1c9   :  { %1927 = vmatmul.bf16.gmra.mxu2 %v3381_v3  ;;  %2060 = vmatmul.bf16.gmra.mxu3 %v3385_v4 }
 0x215   :  { %v1647_v25 = vpop.f32.mrf.mxu0  ;;  %v1780_v26 = vpop.f32.mrf.mxu1 }
 0x216   :  { %v1781_v27 = vadd.f32 %v1780_v26, %v1710_v23  ;;  %v1648_v28 = vadd.f32 %v1647_v25, %v1529_v24 }
 0x218   :  { %v1800_v29 = vmax.f32 %v1781_v27, 0.0  ;;  %v1667_v30 = vmax.f32 %v1648_v28, 0.0 }
 0x21a   :  { %v1808_v31 = vpack.c.bf16 %v1800_v29, %v1800_v29  ;;  %v1675_v32 = vpack.c.bf16 %v1667_v30, %v1667_v30 }
 0x21c   :  { %1816 = vst [vmem:[#allocation3 + $0x4] sm:$0xf] %v1808_v31  ;;  %v1913_v35 = vpop.f32.mrf.mxu2  ;;  %v2046_v36 = vpop.f32.mrf.mxu3 }
 0x21d   :  { %v1914_v37 = vadd.f32 %v1913_v35, %v1843_v18  ;;  %v2047_v38 = vadd.f32 %v2046_v36, %v1976_v16  ;;  %v1649_v39 = vpop.f32.mrf.mxu0  ;;  %v1782_v41 = vpop.f32.mrf.mxu1  ;;  %1683 = vst [vmem:[#allocation3] sm:$0xf] %v1675_v32 }
 0x21e   :  { %v1783_v42 = vadd.f32 %v1782_v41, %v1715_v33  ;;  %v1650_v43 = vadd.f32 %v1649_v39, %v1534_v34 }
 0x21f   :  { %v1933_v44 = vmax.f32 %v1914_v37, 0.0  ;;  %v2066_v47 = vmax.f32 %v2047_v38, 0.0 }
 0x220   :  { %v1801_v48 = vmax.f32 %v1783_v42, 0.0  ;;  %v1668_v45 = vmax.f32 %v1650_v43, 0.0 }
 0x221   :  { %v1941_v50 = vpack.c.bf16 %v1933_v44, %v1933_v44  ;;  %v2074_v53 = vpack.c.bf16 %v2066_v47, %v2066_v47 }
 0x222   :  { %v1809_v56 = vpack.c.bf16 %v1801_v48, %v1801_v48  ;;  %v1676_v59 = vpack.c.bf16 %v1668_v45, %v1668_v45 }
 0x223   :  { %1949 = vst [vmem:[#allocation3 + $0x8] sm:$0xf] %v1941_v50 }
 0x224   :  { %2082 = vst [vmem:[#allocation3 + $0xc] sm:$0xf] %v2074_v53  ;;  %v1915_v61 = vpop.f32.mrf.mxu2  ;;  %v2048_v62 = vpop.f32.mrf.mxu3 }
 0x225   :  { %1817 = vst [vmem:[#allocation3 + $0x14] sm:$0xf] %v1809_v56  ;;  %v1916_v49 = vadd.f32 %v1915_v61, %v1848_v20  ;;  %v2049_v63 = vadd.f32 %v2048_v62, %v1981_v15  ;;  %v1652_v58 = vpop.f32.mrf.mxu0  ;;  %v1785_v46 = vpop.f32.mrf.mxu1 }
 0x226   :  { %1684 = vst [vmem:[#allocation3 + $0x10] sm:$0xf] %v1676_v59  ;;  %v1653_v3 = vadd.f32 %v1652_v58, %v1539_v22  ;;  %v1786_v4 = vadd.f32 %v1785_v46, %v1720_v17 }
 0x227   :  { %v1934_v16 = vmax.f32 %v1916_v49, 0.0  ;;  %v2067_v18 = vmax.f32 %v2049_v63, 0.0 }
 0x228   :  { %v1669_v23 = vmax.f32 %v1653_v3, 0.0  ;;  %v1802_v24 = vmax.f32 %v1786_v4, 0.0 }
 0x229   :  { %v1942_v25 = vpack.c.bf16 %v1934_v16, %v1934_v16  ;;  %v2075_v26 = vpack.c.bf16 %v2067_v18, %v2067_v18 }
 0x22a   :  { %v1677_v27 = vpack.c.bf16 %v1669_v23, %v1669_v23  ;;  %v1810_v28 = vpack.c.bf16 %v1802_v24, %v1802_v24 }
 0x22b   :  { %1950 = vst [vmem:[#allocation3 + $0x18] sm:$0xf] %v1942_v25 }
 0x22c   :  { %2083 = vst [vmem:[#allocation3 + $0x1c] sm:$0xf] %v2075_v26  ;;  %v1918_v29 = vpop.f32.mrf.mxu2  ;;  %v2051_v30 = vpop.f32.mrf.mxu3 }
 0x22d   :  { %1685 = vst [vmem:[#allocation3 + $0x20] sm:$0xf] %v1677_v27  ;;  %v1919_v15 = vadd.f32 %v1918_v29, %v3774_v13  ;;  %v2052_v20 = vadd.f32 %v2051_v30, %v3764_v10  ;;  %v1654_v31 = vpop.f32.mrf.mxu0  ;;  %v1787_v22 = vpop.f32.mrf.mxu1 }
 0x22e   :  { %1818 = vst [vmem:[#allocation3 + $0x24] sm:$0xf] %v1810_v28  ;;  %v1655_v17 = vadd.f32 %v1654_v31, %v1544_v21  ;;  %v1788_v32 = vadd.f32 %v1787_v22, %v3782_v19 }
 0x22f   :  { %v1935_v33 = vmax.f32 %v1919_v15, 0.0  ;;  %v2068_v34 = vmax.f32 %v2052_v20, 0.0 }
 0x230   :  { %v1670_v35 = vmax.f32 %v1655_v17, 0.0  ;;  %v1803_v36 = vmax.f32 %v1788_v32, 0.0 }
 0x231   :  { %v1943_v37 = vpack.c.bf16 %v1935_v33, %v1935_v33  ;;  %v2076_v38 = vpack.c.bf16 %v2068_v34, %v2068_v34 }
 0x232   :  { %v1678_v39 = vpack.c.bf16 %v1670_v35, %v1670_v35  ;;  %v1811_v41 = vpack.c.bf16 %v1803_v36, %v1803_v36 }
 0x233   :  { %1951 = vst [vmem:[#allocation3 + $0x28] sm:$0xf] %v1943_v37 }
 0x234   :  { %2084 = vst [vmem:[#allocation3 + $0x2c] sm:$0xf] %v2076_v38  ;;  %v1920_v42 = vpop.f32.mrf.mxu2  ;;  %v2053_v13 = vpop.f32.mrf.mxu3 }
 0x235   :  { %1686 = vst [vmem:[#allocation3 + $0x30] sm:$0xf] %v1678_v39  ;;  %v1921_v10 = vadd.f32 %v1920_v42, %v3778_v14  ;;  %v2054_v43 = vadd.f32 %v2053_v13, %v3768_v51  ;;  %v1657_v21 = vpop.f32.mrf.mxu0  ;;  %v1790_v44 = vpop.f32.mrf.mxu1 }
 0x236   :  { %1819 = vst [vmem:[#allocation3 + $0x34] sm:$0xf] %v1811_v41  ;;  %v1658_v19 = vadd.f32 %v1657_v21, %v3776_v57  ;;  %v1791_v47 = vadd.f32 %v1790_v44, %v3772_v52 }
 0x237   :  { %v1936_v48 = vmax.f32 %v1921_v10, 0.0  ;;  %v2069_v45 = vmax.f32 %v2054_v43, 0.0 }
 0x238   :  { %v1671_v50 = vmax.f32 %v1658_v19, 0.0  ;;  %v1804_v53 = vmax.f32 %v1791_v47, 0.0 }
 0x239   :  { %v1944_v56 = vpack.c.bf16 %v1936_v48, %v1936_v48  ;;  %v2077_v59 = vpack.c.bf16 %v2069_v45, %v2069_v45 }
 0x23a   :  { %v1679_v61 = vpack.c.bf16 %v1671_v50, %v1671_v50  ;;  %v1812_v62 = vpack.c.bf16 %v1804_v53, %v1804_v53 }
 0x23b   :  { %1952 = vst [vmem:[#allocation3 + $0x38] sm:$0xf] %v1944_v56 }
 0x23c   :  { %2085 = vst [vmem:[#allocation3 + $0x3c] sm:$0xf] %v2077_v59  ;;  %v1923_v14 = vpop.f32.mrf.mxu2  ;;  %v2056_v49 = vpop.f32.mrf.mxu3 }
 0x23d   :  { %1687 = vst [vmem:[#allocation3 + $0x40] sm:$0xf] %v1679_v61  ;;  %v1924_v51 = vadd.f32 %v1923_v14, %v3760_v8  ;;  %v2057_v63 = vadd.f32 %v2056_v49, %v3736_v2  ;;  %v1659_v57 = vpop.f32.mrf.mxu0  ;;  %v1792_v58 = vpop.f32.mrf.mxu1 }
 0x23e   :  { %1820 = vst [vmem:[#allocation3 + $0x44] sm:$0xf] %v1812_v62  ;;  %v1660_v52 = vadd.f32 %v1659_v57, %v3780_v40  ;;  %v1793_v46 = vadd.f32 %v1792_v58, %v3770_v12 }
 0x23f   :  { %v1937_v3 = vmax.f32 %v1924_v51, 0.0  ;;  %v2070_v4 = vmax.f32 %v2057_v63, 0.0 }
 0x240   :  { %v1672_v16 = vmax.f32 %v1660_v52, 0.0  ;;  %v1805_v18 = vmax.f32 %v1793_v46, 0.0  ;;  %v3392_v52 = vld [vmem:[#allocation3 + $0x2c] sm:$0xf0] }
 0x241   :  { %v1945_v23 = vpack.c.bf16 %v1937_v3, %v1937_v3  ;;  %v2078_v24 = vpack.c.bf16 %v2070_v4, %v2070_v4 }
 0x242   :  { %v1680_v25 = vpack.c.bf16 %v1672_v16, %v1672_v16  ;;  %v1813_v26 = vpack.c.bf16 %v1805_v18, %v1805_v18  ;;  %v3140_v16 = vld [vmem:[#allocation3 + $0x30] sm:$0xf0] }
 0x243   :  { %1953 = vst [vmem:[#allocation3 + $0x48] sm:$0xf] %v1945_v23  ;;  %v3138_v23 = vld [vmem:[#allocation3 + $0x20] sm:$0xf] }
 0x244   :  { %2086 = vst [vmem:[#allocation3 + $0x4c] sm:$0xf] %v2078_v24  ;;  %v1925_v8 = vpop.f32.mrf.mxu2  ;;  %v2058_v27 = vpop.f32.mrf.mxu3 }
 0x245   :  { %1688 = vst [vmem:[#allocation3 + $0x50] sm:$0xf] %v1680_v25  ;;  %v1926_v2 = vadd.f32 %v1925_v8, %v3758_v7  ;;  %v2059_v28 = vadd.f32 %v2058_v27, %v3754_v5  ;;  %v1662_v40 = vpop.f32.mrf.mxu0  ;;  %v1795_v29 = vpop.f32.mrf.mxu1  ;;  %v3139_v25 = vor.u32 %v3392_v52, %v3138_v23 }
 0x246   :  { %1821 = vst [vmem:[#allocation3 + $0x54] sm:$0xf] %v1813_v26  ;;  %v1663_v12 = vadd.f32 %v1662_v40, %v3762_v9  ;;  %v1796_v30 = vadd.f32 %v1795_v29, %v3740_v55  ;;  %v3390_v26 = vld [vmem:[#allocation3 + $0x24] sm:$0xf] }
 0x247   :  { %v1938_v15 = vmax.f32 %v1926_v2, 0.0  ;;  %v2071_v20 = vmax.f32 %v2059_v28, 0.0  ;;  %v3143_v27 = vor.u32 %v3390_v26, %v3140_v16  ;;  %v3388_v28 = vld [vmem:[#allocation3 + $0xc] sm:$0xf0] }
 0x248   :  { %v1673_v31 = vmax.f32 %v1663_v12, 0.0  ;;  %v1806_v22 = vmax.f32 %v1796_v30, 0.0  ;;  %v3124_v12 = vld [vmem:[#allocation3 + $0x10] sm:$0xf0] }
 0x249   :  { %v1946_v17 = vpack.c.bf16 %v1938_v15, %v1938_v15  ;;  %v2079_v32 = vpack.c.bf16 %v2071_v20, %v2071_v20  ;;  %v3122_v15 = vld [vmem:[#allocation3] sm:$0xf]  ;;  %v3393_v20 = vld [vmem:[#allocation3 + $0x34] sm:$0xf0] }
 0x24a   :  { %v1681_v33 = vpack.c.bf16 %v1673_v31, %v1673_v31  ;;  %v1814_v34 = vpack.c.bf16 %v1806_v22, %v1806_v22  ;;  %v3162_v2 = vld [vmem:[#allocation3 + $0x48] sm:$0xf]  ;;  %v3123_v31 = vor.u32 %v3388_v28, %v3122_v15  ;;  %v3386_v22 = vld [vmem:[#allocation3 + $0x4] sm:$0xf] }
 0x24b   :  { %1954 = vst [vmem:[#allocation3 + $0x58] sm:$0xf] %v1946_v17  ;;  %v3395_v29 = vld [vmem:[#allocation3 + $0x4c] sm:$0xf]  ;;  %v3148_v17 = vld [vmem:[#allocation3 + $0x38] sm:$0xf0] }
 0x24c   :  { %2087 = vst [vmem:[#allocation3 + $0x5c] sm:$0xf] %v2079_v32  ;;  %v1928_v7 = vpop.f32.mrf.mxu2  ;;  %v2061_v35 = vpop.f32.mrf.mxu3  ;;  %v3396_v14 = vld [vmem:[#allocation3 + $0x4c] sm:$0xf0]  ;;  %v3127_v32 = vor.u32 %v3386_v22, %v3124_v12 }
 0x24d   :  { %1689 = vst [vmem:[#allocation3 + $0x60] sm:$0xf] %v1681_v33  ;;  %v1929_v5 = vadd.f32 %v1928_v7, %v3732_v0  ;;  %v2062_v36 = vadd.f32 %v2061_v35, %v3718_v60  ;;  %v1664_v9 = vpop.f32.mrf.mxu0  ;;  %v1797_v37 = vpop.f32.mrf.mxu1  ;;  %v3156_v49 = vld [vmem:[#allocation3 + $0x50] sm:$0xf0]  ;;  %v3146_v33 = vld [vmem:[#allocation3 + $0x28] sm:$0xf] }
 0x24e   :  { %1822 = vst [vmem:[#allocation3 + $0x64] sm:$0xf] %v1814_v34  ;;  %v1665_v55 = vadd.f32 %v1664_v9, %v3766_v11  ;;  %v1798_v38 = vadd.f32 %v1797_v37, %v3756_v6  ;;  %v3147_v34 = vor.u32 %v3393_v20, %v3146_v33  ;;  %v3391_v7 = vld [vmem:[#allocation3 + $0x2c] sm:$0xf]  ;;  %v2090_v35 = vld [vmem:[%s3830_s4] sm:$0x3] }
 0x24f   :  { %v1939_v39 = vmax.f32 %v1929_v5, 0.0  ;;  %v2072_v41 = vmax.f32 %v2062_v36, 0.0  ;;  %v3151_v5 = vor.u32 %v3391_v7, %v3148_v17  ;;  %v3389_v36 = vld [vmem:[#allocation3 + $0x14] sm:$0xf0]  ;;  %v3132_v9 = vld [vmem:[#allocation3 + $0x18] sm:$0xf0] }
 0x250   :  { %v1674_v42 = vmax.f32 %v1665_v55, 0.0  ;;  %v1807_v13 = vmax.f32 %v1798_v38, 0.0  ;;  %v3130_v37 = vld [vmem:[#allocation3 + $0x8] sm:$0xf]  ;;  %v3387_v38 = vld [vmem:[#allocation3 + $0xc] sm:$0xf] }
 0x251   :  { %v1947_v10 = vpack.c.bf16 %v1939_v39, %v1939_v39  ;;  %v2080_v43 = vpack.c.bf16 %v2072_v41, %v2072_v41  ;;  %v3131_v55 = vor.u32 %v3389_v36, %v3130_v37  ;;  %v3135_v39 = vor.u32 %v3387_v38, %v3132_v9  ;;  %v2112_v41 = vpop.permute.xlu2 %2111 }
 0x252   :  { %v1682_v21 = vpack.c.bf16 %v1674_v42, %v1674_v42  ;;  %v1815_v44 = vpack.c.bf16 %v1807_v13, %v1807_v13  ;;  %v3397_v24 = vld [vmem:[#allocation3 + $0x54] sm:$0xf0] }
 0x253   :  { %1955 = vst [vmem:[#allocation3 + $0x68] sm:$0xf] %v1947_v10  ;;  %v3164_v8 = vld [vmem:[#allocation3 + $0x58] sm:$0xf0]  ;;  %v3163_v40 = vor.u32 %v3397_v24, %v3162_v2 }
 0x254   :  { %2088 = vst [vmem:[#allocation3 + $0x6c] sm:$0xf] %v2080_v43  ;;  %v1930_v0 = vpop.f32.mrf.mxu2  ;;  %v2063_v19 = vpop.f32.mrf.mxu3  ;;  %v3170_v50 = vld [vmem:[#allocation3 + $0x60] sm:$0xf]  ;;  %v3167_v30 = vor.u32 %v3395_v29, %v3164_v8 }
 0x255   :  { %1690 = vst [vmem:[#allocation3 + $0x70] sm:$0xf] %v1682_v21  ;;  %v1931_v60 = vadd.f32 %v1930_v0, %v3738_v54  ;;  %v2064_v47 = vadd.f32 %v2063_v19, %v3734_v1  ;;  %v3398_v59 = vld [vmem:[#allocation3 + $0x64] sm:$0xf]  ;;  %v3154_v54 = vld [vmem:[#allocation3 + $0x40] sm:$0xf] }
 0x256   :  { %1823 = vst [vmem:[#allocation3 + $0x74] sm:$0xf] %v1815_v44  ;;  %v3155_v51 = vor.u32 %v3396_v14, %v3154_v54  ;;  %v3394_v1 = vld [vmem:[#allocation3 + $0x44] sm:$0xf] }
 0x257   :  { %v1940_v11 = vmax.f32 %v1931_v60, 0.0  ;;  %v2073_v6 = vmax.f32 %v2064_v47, 0.0  ;;  %v3159_v63 = vor.u32 %v3394_v1, %v3156_v49 }
 0x259   :  { %v1948_v48 = vpack.c.bf16 %v1940_v11, %v1940_v11  ;;  %v2081_v45 = vpack.c.bf16 %v2073_v6, %v2073_v6 }
 0x25a   :  { %v3178_v57 = vld [vmem:[#allocation3 + $0x68] sm:$0xf] }
 0x25b   :  { %1956 = vst [vmem:[#allocation3 + $0x78] sm:$0xf] %v1948_v48  ;;  %v3399_v3 = vld [vmem:[#allocation3 + $0x6c] sm:$0xf] }
 0x25c   :  { %2089 = vst [vmem:[#allocation3 + $0x7c] sm:$0xf] %v2081_v45  ;;  %v3400_v53 = vld [vmem:[#allocation3 + $0x6c] sm:$0xf0] }
 0x25d   :  { %v3171_v56 = vor.u32 %v3400_v53, %v3170_v50  ;;  %v3172_v61 = vld [vmem:[#allocation3 + $0x70] sm:$0xf0] }
 0x25e   :  { %v3175_v62 = vor.u32 %v3398_v59, %v3172_v61 }
 0x25f   :  { %2202 = vmatpush.bf16.msra.mxu0 %v3171_v56 }
 0x260   :  { %2215 = vmatpush.bf16.msra.mxu1 %v3175_v62 }
 0x262   :  { %v3401_v58 = vld [vmem:[#allocation3 + $0x74] sm:$0xf0] }
 0x263   :  { %2203 = vmatpush.bf16.msra.mxu0 %v3155_v51  ;;  %v3179_v46 = vor.u32 %v3401_v58, %v3178_v57  ;;  %v3180_v4 = vld [vmem:[#allocation3 + $0x78] sm:$0xf0] }
 0x264   :  { %2216 = vmatpush.bf16.msra.mxu1 %v3159_v63  ;;  %v3183_v18 = vor.u32 %v3399_v3, %v3180_v4 }
 0x265   :  { %2228 = vmatpush.bf16.msra.mxu2 %v3179_v46 }
 0x266   :  { %2241 = vmatpush.bf16.msra.mxu3 %v3183_v18 }
 0x267   :  { %2204 = vmatpush.bf16.msra.mxu0 %v3139_v25 }
 0x268   :  { %2217 = vmatpush.bf16.msra.mxu1 %v3143_v27 }
 0x269   :  { %2229 = vmatpush.bf16.msra.mxu2 %v3163_v40 }
 0x26a   :  { %2242 = vmatpush.bf16.msra.mxu3 %v3167_v30 }
 0x26b   :  { %2205 = vmatpush.bf16.msra.mxu0 %v3123_v31 }
 0x26c   :  { %2218 = vmatpush.bf16.msra.mxu1 %v3127_v32 }
 0x26d   :  { %2230 = vmatpush.bf16.msra.mxu2 %v3147_v34 }
 0x26e   :  { %2243 = vmatpush.bf16.msra.mxu3 %v3151_v5  ;;  %3184 = vmatmul.msk.bf16.vlgmr.msra.gmra.mxu0 %vm2194_vm0, %v2090_v35 }
 0x26f   :  { %3185 = vmatmul.msk.bf16.vlgmr.msra.gmra.mxu1 %vm2194_vm0, %v2090_v35 }
 0x271   :  { %2231 = vmatpush.bf16.msra.mxu2 %v3131_v55 }
 0x272   :  { %2244 = vmatpush.bf16.msra.mxu3 %v3135_v39 }
 0x274   :  { %3186 = vmatmul.msk.bf16.vlgmr.msra.gmra.mxu2 %vm2194_vm0, %v2090_v35 }
 0x275   :  { %3187 = vmatmul.msk.bf16.vlgmr.msra.gmra.mxu3 %vm2194_vm0, %v2090_v35 }
 0x2eb   :  { %v2207_v42 = vpop.f32.mrf.mxu0 }
 0x2ec   :  { %v2208_v13 = vadd.f32 %v2207_v42, %v2112_v41  ;;  %v2220_v10 = vpop.f32.mrf.mxu1 }
 0x2ed   :  { %v2221_v43 = vadd.f32 %v2220_v10, %v2112_v41 }
 0x2ee   :  { %v3188_v21 = vmul.f32 -1.442695, %v2208_v13 }
 0x2ef   :  { %v3189_v44 = vmul.f32 -1.442695, %v2221_v43 }
 0x2f0   :  { %3457 = vpow2.f32 %v3188_v21 }
 0x2f1   :  { %3459 = vpow2.f32 %v3189_v44 }
 0x2f3   :  { %v2209_v0 = vpop.f32.mrf.mxu0 }
 0x2f4   :  { %v2222_v19 = vpop.f32.mrf.mxu1 }
 0x2f6   :  { %v3458_v60 = vpop.eup %3457 }
 0x2f7   :  { %v3460_v47 = vpop.eup %3459  ;;  %v2262_v11 = vadd.f32 1.0, %v3458_v60  ;;  %v2233_v6 = vpop.f32.mrf.mxu2 }
 0x2f8   :  { %v2263_v48 = vadd.f32 1.0, %v3460_v47  ;;  %v2234_v45 = vadd.f32 %v2233_v6, %v2112_v41  ;;  %v2246_v50 = vpop.f32.mrf.mxu3 }
 0x2f9   :  { %3461 = vrcp.f32 %v2262_v11  ;;  %v2247_v56 = vadd.f32 %v2246_v50, %v2112_v41  ;;  %vm2271_vm3 = vweird.f32 %v2262_v11  ;;  %v2277_v23 = vand.u32 2147483648, %v2262_v11 }
 0x2fa   :  { %3463 = vrcp.f32 %v2263_v48  ;;  %v3190_v53 = vmul.f32 -1.442695, %v2234_v45  ;;  %v2292_v52 = vand.u32 2147483648, %v2263_v48  ;;  %v2290_v16 = vand.u32 2147483647, %v2263_v48 }
 0x2fb   :  { %v3191_v59 = vmul.f32 -1.442695, %v2247_v56  ;;  %v2275_v25 = vand.u32 2147483647, %v2262_v11  ;;  %vm2286_vm5 = vweird.f32 %v2263_v48  ;;  %v2278_v40 = vor.u32 1.1754944e-38, %v2277_v23 }
 0x2fc   :  { %3465 = vpow2.f32 %v3190_v53  ;;  %v2293_v27 = vor.u32 1.1754944e-38, %v2292_v52  ;;  %vm2291_vm7 = vcmp.eq.f32.partialorder %v2290_v16, 8.507059e+37 }
 0x2fd   :  { %3467 = vpow2.f32 %v3191_v59  ;;  %vm2276_vm9 = vcmp.eq.f32.partialorder %v2275_v25, 8.507059e+37 }
 0x2ff   :  { %v3462_v61 = vpop.eup %3461  ;;  %v2235_v62 = vpop.f32.mrf.mxu2 }
 0x300   :  { %v3464_v14 = vpop.eup %3463  ;;  %v2267_v49 = vmul.f32 %v3462_v61, %v2262_v11  ;;  %v2248_v54 = vpop.f32.mrf.mxu3  ;;  %vm2272_vm1 = vweird.f32 %v3462_v61 }
 0x301   :  { %v2282_v51 = vmul.f32 %v3464_v14, %v2263_v48  ;;  %vm2287_vm2 = vweird.f32 %v3464_v14  ;;  %vm3812_vm4 = vmor %vm2271_vm3, %vm2272_vm1 }
 0x302   :  { %v2268_v1 = vsub.f32 1.0, %v2267_v49  ;;  %v3466_v63 = vpop.eup %3465  ;;  %vm2288_vm6 = vmor %vm2286_vm5, %vm2287_vm2 }
 0x303   :  { %v2283_v57 = vsub.f32 1.0, %v2282_v51  ;;  %v2264_v46 = vadd.f32 1.0, %v3466_v63  ;;  %v3468_v3 = vpop.eup %3467 }
 0x304   :  { %v2269_v58 = vmul.f32 %v3462_v61, %v2268_v1  ;;  %v2265_v8 = vadd.f32 1.0, %v3468_v3 }
 0x305   :  { %v2284_v4 = vmul.f32 %v3464_v14, %v2283_v57  ;;  %3469 = vrcp.f32 %v2264_v46  ;;  %vm2301_vm12 = vweird.f32 %v2264_v46  ;;  %v2307_v9 = vand.u32 2147483648, %v2264_v46 }
 0x306   :  { %v2270_v18 = vadd.f32 %v3462_v61, %v2269_v58  ;;  %3471 = vrcp.f32 %v2265_v8  ;;  %v2322_v7 = vand.u32 2147483648, %v2265_v8  ;;  %v2320_v36 = vand.u32 2147483647, %v2265_v8 }
 0x307   :  { %v2285_v26 = vadd.f32 %v3464_v14, %v2284_v4  ;;  %v2305_v37 = vand.u32 2147483647, %v2264_v46  ;;  %vm2316_vm14 = vweird.f32 %v2265_v8  ;;  %v2308_v42 = vor.u32 1.1754944e-38, %v2307_v9 }
 0x308   :  { %v2274_v2 = vsel %vm3812_vm4, %v3462_v61, %v2270_v18  ;;  %v2323_v38 = vor.u32 1.1754944e-38, %v2322_v7  ;;  %vm2321_vm0 = vcmp.eq.f32.partialorder %v2320_v36, 8.507059e+37 }
 0x309   :  { %v2289_v28 = vsel %vm2288_vm6, %v3464_v14, %v2285_v26  ;;  %v2279_v15 = vsel %vm2276_vm9, %v2278_v40, %v2274_v2  ;;  %vm2306_vm1 = vcmp.eq.f32.partialorder %v2305_v37, 8.507059e+37 }
 0x30a   :  { %v2294_v29 = vsel %vm2291_vm7, %v2293_v27, %v2289_v28 }
 0x30b   :  { %v2330_v12 = vrot.slane %v2294_v29, 4  ;;  %v3470_v30 = vpop.eup %3469 }
 0x30c   :  { %v2297_v31 = vmul.f32 %v3470_v30, %v2264_v46  ;;  %v3472_v22 = vpop.eup %3471  ;;  %vm2302_vm10 = vweird.f32 %v3470_v30 }
 0x30d   :  { %v2333_v20 = vsel %vm2332_vm8, %v2279_v15, %v2330_v12  ;;  %v2312_v32 = vmul.f32 %v3472_v22, %v2265_v8  ;;  %vm2317_vm11 = vweird.f32 %v3472_v22  ;;  %vm2303_vm13 = vmor %vm2301_vm12, %vm2302_vm10 }
 0x30e   :  { %2337 = vst [vmem:[%s3832_s6] sm:$0xff] %v2333_v20  ;;  %v2298_v17 = vsub.f32 1.0, %v2297_v31  ;;  %vm2318_vm15 = vmor %vm2316_vm14, %vm2317_vm11 }
 0x30f   :  { %v2313_v34 = vsub.f32 1.0, %v2312_v32 }
 0x310   :  { %v2299_v33 = vmul.f32 %v3470_v30, %v2298_v17 }
 0x311   :  { %v2314_v5 = vmul.f32 %v3472_v22, %v2313_v34 }
 0x312   :  { %v2300_v35 = vadd.f32 %v3470_v30, %v2299_v33 }
 0x313   :  { %v2315_v55 = vadd.f32 %v3472_v22, %v2314_v5 }
 0x314   :  { %v2304_v39 = vsel %vm2303_vm13, %v3470_v30, %v2300_v35 }
 0x315   :  { %v2319_v41 = vsel %vm2318_vm15, %v3472_v22, %v2315_v55  ;;  %v2309_v43 = vsel %vm2306_vm1, %v2308_v42, %v2304_v39 }
 0x316   :  { %v2324_v13 = vsel %vm2321_vm0, %v2323_v38, %v2319_v41 }
 0x317   :  { %v2331_v10 = vrot.slane %v2324_v13, 4 }
 0x319   :  { %v2334_v21 = vsel %vm2332_vm8, %v2309_v43, %v2331_v10 }
 0x31a   :  { %2338 = vst [vmem:[%s3832_s6 + $0x8] sm:$0xff] %v2334_v21 }
 0x31b   :  { %2343 = vsyncpa [#allocation6], 1 }

</bundles_post_ra>
